<compile_context>
chip_gen: v7x
topology: tpu7x:2x2x1
jax: 0.10.0
libtpu: 0.0.40
codegen_flags: <defaults>
</compile_context>

<pallas_src>
import jax
import jax.numpy as jnp
from jax import lax
from jax.experimental import pallas as pl
from jax.experimental.pallas import tpu as pltpu


def predictive_keyboard_kernel(ids_ref, emb_ref, w_ih_ref, w_hh_ref, b_ref,
                               w_fc_ref, b_fc_ref, out_ref, gx_scr):
    """Fused embedding -> LSTM -> final Linear (last timestep) kernel.

    ids_ref : SMEM (B, T)     int32  token ids
    emb_ref : VMEM (V, E)     bf16   embedding table
    w_ih_ref: VMEM (E, 4H)    bf16   input->hidden weights  (transposed vs. PyTorch)
    w_hh_ref: VMEM (H, 4H)    bf16   hidden->hidden weights (transposed vs. PyTorch)
    b_ref   : VMEM (1, 4H)    f32    combined b_ih + b_hh
    w_fc_ref: VMEM (H, V)     bf16   final Linear weight    (transposed vs. PyTorch)
    b_fc_ref: VMEM (1, V)     f32    final Linear bias
    out_ref : VMEM (B, V)     f32    logits
    gx_scr  : VMEM (T*Bp, 4H) f32    scratch: hoisted input projection, time-major
    """
    B, T = ids_ref.shape
    V, E = emb_ref.shape
    TBp, H4 = gx_scr.shape
    H = H4 // 4
    Bp = TBp // T          # batch padded to a full sublane group; rows b >= B are dead

    # ---- Embedding gather: one-hot(ids) @ table on the MXU. Exact for one-hot rows,
    #      so it equals a bf16 row gather; ids are read as SMEM scalars.
    # TODO(synk): for large vocabularies replace this O(T*Bp*V) one-hot matmul with a
    #             DMA row gather; at keyboard-sized V the matmul is cheaper and safer.
    rsel = lax.broadcasted_iota(jnp.int32, (TBp, 1), 0)
    ids_col = jnp.full((TBp, 1), -1, jnp.int32)        # -1 -> all-zero one-hot row (pad)
    for t in range(T):
        for b in range(B):
            ids_col = jnp.where(rsel == t * Bp + b, ids_ref[b, t], ids_col)
    onehot = (lax.broadcasted_iota(jnp.int32, (TBp, V), 1) == ids_col
              ).astype(jnp.bfloat16)                   # (T*Bp, V)
    xemb = jnp.dot(onehot, emb_ref[...],
                   preferred_element_type=jnp.float32)  # (T*Bp, E) f32

    # ---- Hoisted input projection with the combined LSTM bias folded in; stored to a
    #      VMEM scratch so the unrolled recurrence only keeps one step's gates live.
    gx_scr[...] = (
        jnp.dot(xemb.astype(jnp.bfloat16), w_ih_ref[...],
                preferred_element_type=jnp.float32)
        + b_ref[...]
    )

    # ---- Serial LSTM recurrence (PyTorch gate order i, f, g, o), fully unrolled.
    # TODO(synk): if the recurrence ever dominates, stage w_hh in MXU weight registers
    #             across the T loop via pltpu.matmul_push_rhs / matmul_acc_lhs.
    whh = w_hh_ref[...]                                 # (H, 4H) bf16, loaded once
    h = jnp.zeros((Bp, H), jnp.float32)
    c = jnp.zeros((Bp, H), jnp.float32)
    for t in range(T):
        g = gx_scr[pl.ds(t * Bp, Bp), :] + jnp.dot(
            h.astype(jnp.bfloat16), whh, preferred_element_type=jnp.float32)
        i_f = jax.nn.sigmoid(g[:, 0:2 * H])             # i|f adjacent: one wide sigmoid
        g_g = jnp.tanh(g[:, 2 * H:3 * H])
        o_g = jax.nn.sigmoid(g[:, 3 * H:4 * H])
        c = i_f[:, H:2 * H] * c + i_f[:, 0:H] * g_g
        h = o_g * jnp.tanh(c)

    # ---- Final Linear on the last hidden state; drop batch padding on the store.
    # TODO(synk): for large V, split the FC into a >=2-point "parallel" vocab-tiled
    #             pallas_call (uses both v7x TensorCores) with a generation-aware
    #             VMEM budget (~32 MiB scoped on v7x vs ~2x that on v5e/v6e).
    logits = (
        jnp.dot(h.astype(jnp.bfloat16), w_fc_ref[...],
                preferred_element_type=jnp.float32)
        + b_fc_ref[...]
    )                                                   # (Bp, V) f32
    out_ref[...] = logits[:B, :]


def prepare_params(emb_table, w_ih_pt, w_hh_pt, b_ih, b_hh, w_fc_pt, b_fc):
    """One-time parameter preprocessing (transposes / casts / bias combine)."""
    return dict(
        emb=emb_table.astype(jnp.bfloat16),              # (V, E)  bf16
        w_ih=w_ih_pt.T.astype(jnp.bfloat16),             # (E, 4H) bf16
        w_hh=w_hh_pt.T.astype(jnp.bfloat16),             # (H, 4H) bf16
        b=(b_ih + b_hh)[None, :].astype(jnp.float32),    # (1, 4H) f32 combined bias
        w_fc=w_fc_pt.T.astype(jnp.bfloat16),             # (H, V)  bf16
        b_fc=b_fc[None, :].astype(jnp.float32),          # (1, V)  f32
    )


@jax.jit
def predictive_keyboard_forward(x_ids, params):
    B, T = x_ids.shape
    V, E = params["emb"].shape
    H = params["w_hh"].shape[0]
    Bp = max(8, ((B + 7) // 8) * 8)                      # pad batch to a sublane group

    smem = pl.BlockSpec(memory_space=pltpu.MemorySpace.SMEM)
    vmem = pl.BlockSpec(memory_space=pltpu.MemorySpace.VMEM)
    return pl.pallas_call(
        predictive_keyboard_kernel,
        out_shape=jax.ShapeDtypeStruct((B, V), jnp.float32),
        in_specs=[smem, vmem, vmem, vmem, vmem, vmem, vmem],
        out_specs=vmem,
        scratch_shapes=[pltpu.VMEM((T * Bp, 4 * H), jnp.float32)],
    )(x_ids, params["emb"], params["w_ih"], params["w_hh"], params["b"],
      params["w_fc"], params["b_fc"])


def reference_forward(x_ids, emb_table, w_ih_pt, w_hh_pt, b_ih, b_hh, w_fc_pt, b_fc):
    """Pure-JAX f32 reference mirroring PyTorch nn.LSTM semantics (gate order i,f,g,o)."""
    emb = emb_table[x_ids]                               # (B, T, E)
    B, T, E = emb.shape
    H = w_hh_pt.shape[1]

    def step(carry, x_t):
        h, c = carry
        gates = x_t @ w_ih_pt.T + b_ih + h @ w_hh_pt.T + b_hh
        i = jax.nn.sigmoid(gates[:, 0 * H:1 * H])
        f = jax.nn.sigmoid(gates[:, 1 * H:2 * H])
        g = jnp.tanh(gates[:, 2 * H:3 * H])
        o = jax.nn.sigmoid(gates[:, 3 * H:4 * H])
        c_new = f * c + i * g
        h_new = o * jnp.tanh(c_new)
        return (h_new, c_new), None

    h0 = jnp.zeros((B, H), jnp.float32)
    c0 = jnp.zeros((B, H), jnp.float32)
    (h_last, _), _ = lax.scan(step, (h0, c0), jnp.transpose(emb, (1, 0, 2)))
    return h_last @ w_fc_pt.T + b_fc


if __name__ == "__main__":
    # Module defaults: embed_dim=64, hidden_dim=128; small vocab & batch for the test.
    vocab_size, embed_dim, hidden_dim = 100, 64, 128
    B, T = 2, 8

    key = jax.random.PRNGKey(0)
    ks = jax.random.split(key, 8)
    scale = 0.1

    # Deterministic synthetic parameters in PyTorch shapes, preprocessed once.
    emb_table = scale * jax.random.normal(ks[0], (vocab_size, embed_dim), jnp.float32)
    w_ih_pt = scale * jax.random.normal(ks[1], (4 * hidden_dim, embed_dim), jnp.float32)
    w_hh_pt = scale * jax.random.normal(ks[2], (4 * hidden_dim, hidden_dim), jnp.float32)
    b_ih = scale * jax.random.normal(ks[3], (4 * hidden_dim,), jnp.float32)
    b_hh = scale * jax.random.normal(ks[4], (4 * hidden_dim,), jnp.float32)
    w_fc_pt = scale * jax.random.normal(ks[5], (vocab_size, hidden_dim), jnp.float32)
    b_fc = scale * jax.random.normal(ks[6], (vocab_size,), jnp.float32)

    params = prepare_params(emb_table, w_ih_pt, w_hh_pt, b_ih, b_hh, w_fc_pt, b_fc)
    x_ids = jax.random.randint(ks[7], (B, T), 0, vocab_size, dtype=jnp.int32)

    out = jax.block_until_ready(predictive_keyboard_forward(x_ids, params))
    assert out.shape == (B, vocab_size), out.shape

    ref = reference_forward(x_ids, emb_table, w_ih_pt, w_hh_pt, b_ih, b_hh, w_fc_pt, b_fc)
    max_err = float(jnp.abs(out - ref).max())
    assert jnp.allclose(out, ref, atol=2e-2, rtol=2e-2), max_err

    print("KERNEL_OK")
</pallas_src>

<mosaic_0001>
module attributes {stable_mosaic.version = 11 : i64} {
  func.func @predictive_keyboard_kernel(%arg0: memref<2x8xi32, #tpu.memory_space<smem>>, %arg1: memref<100x64xbf16, #tpu.memory_space<vmem>>, %arg2: memref<64x512xbf16, #tpu.memory_space<vmem>>, %arg3: memref<128x512xbf16, #tpu.memory_space<vmem>>, %arg4: memref<1x512xf32, #tpu.memory_space<vmem>>, %arg5: memref<128x100xbf16, #tpu.memory_space<vmem>>, %arg6: memref<1x100xf32, #tpu.memory_space<vmem>>, %arg7: memref<2x100xf32, #tpu.memory_space<vmem>>, %arg8: memref<64x512xf32, #tpu.memory_space<vmem>>) attributes {dimension_semantics = [], scalar_prefetch = 0 : i64, scratch_operands = 1 : i64, tpu.core_type = #tpu.core_type<tc>} {
    %0 = tpu.iota {dimensions = array<i32: 0>} : vector<64x1xi32>
    %c-1_i32 = arith.constant -1 : i32
    %1 = vector.broadcast %c-1_i32 : i32 to vector<64x1xi32>
    %c0_i32 = arith.constant 0 : i32
    %2 = vector.broadcast %c0_i32 : i32 to vector<64x1xi32>
    %3 = arith.cmpi eq, %0, %2 : vector<64x1xi32>
    %c0 = arith.constant 0 : index
    %c0_0 = arith.constant 0 : index
    %4 = memref.load %arg0[%c0, %c0_0] : memref<2x8xi32, #tpu.memory_space<smem>>
    %5 = vector.broadcast %4 : i32 to vector<64x1xi32>
    %6 = arith.select %3, %5, %1 : vector<64x1xi1>, vector<64x1xi32>
    %c1_i32 = arith.constant 1 : i32
    %7 = vector.broadcast %c1_i32 : i32 to vector<64x1xi32>
    %8 = arith.cmpi eq, %0, %7 : vector<64x1xi32>
    %c1 = arith.constant 1 : index
    %c0_1 = arith.constant 0 : index
    %9 = memref.load %arg0[%c1, %c0_1] : memref<2x8xi32, #tpu.memory_space<smem>>
    %10 = vector.broadcast %9 : i32 to vector<64x1xi32>
    %11 = arith.select %8, %10, %6 : vector<64x1xi1>, vector<64x1xi32>
    %c8_i32 = arith.constant 8 : i32
    %12 = vector.broadcast %c8_i32 : i32 to vector<64x1xi32>
    %13 = arith.cmpi eq, %0, %12 : vector<64x1xi32>
    %c0_2 = arith.constant 0 : index
    %c1_3 = arith.constant 1 : index
    %14 = memref.load %arg0[%c0_2, %c1_3] : memref<2x8xi32, #tpu.memory_space<smem>>
    %15 = vector.broadcast %14 : i32 to vector<64x1xi32>
    %16 = arith.select %13, %15, %11 : vector<64x1xi1>, vector<64x1xi32>
    %c9_i32 = arith.constant 9 : i32
    %17 = vector.broadcast %c9_i32 : i32 to vector<64x1xi32>
    %18 = arith.cmpi eq, %0, %17 : vector<64x1xi32>
    %c1_4 = arith.constant 1 : index
    %c1_5 = arith.constant 1 : index
    %19 = memref.load %arg0[%c1_4, %c1_5] : memref<2x8xi32, #tpu.memory_space<smem>>
    %20 = vector.broadcast %19 : i32 to vector<64x1xi32>
    %21 = arith.select %18, %20, %16 : vector<64x1xi1>, vector<64x1xi32>
    %c16_i32 = arith.constant 16 : i32
    %22 = vector.broadcast %c16_i32 : i32 to vector<64x1xi32>
    %23 = arith.cmpi eq, %0, %22 : vector<64x1xi32>
    %c0_6 = arith.constant 0 : index
    %c2 = arith.constant 2 : index
    %24 = memref.load %arg0[%c0_6, %c2] : memref<2x8xi32, #tpu.memory_space<smem>>
    %25 = vector.broadcast %24 : i32 to vector<64x1xi32>
    %26 = arith.select %23, %25, %21 : vector<64x1xi1>, vector<64x1xi32>
    %c17_i32 = arith.constant 17 : i32
    %27 = vector.broadcast %c17_i32 : i32 to vector<64x1xi32>
    %28 = arith.cmpi eq, %0, %27 : vector<64x1xi32>
    %c1_7 = arith.constant 1 : index
    %c2_8 = arith.constant 2 : index
    %29 = memref.load %arg0[%c1_7, %c2_8] : memref<2x8xi32, #tpu.memory_space<smem>>
    %30 = vector.broadcast %29 : i32 to vector<64x1xi32>
    %31 = arith.select %28, %30, %26 : vector<64x1xi1>, vector<64x1xi32>
    %c24_i32 = arith.constant 24 : i32
    %32 = vector.broadcast %c24_i32 : i32 to vector<64x1xi32>
    %33 = arith.cmpi eq, %0, %32 : vector<64x1xi32>
    %c0_9 = arith.constant 0 : index
    %c3 = arith.constant 3 : index
    %34 = memref.load %arg0[%c0_9, %c3] : memref<2x8xi32, #tpu.memory_space<smem>>
    %35 = vector.broadcast %34 : i32 to vector<64x1xi32>
    %36 = arith.select %33, %35, %31 : vector<64x1xi1>, vector<64x1xi32>
    %c25_i32 = arith.constant 25 : i32
    %37 = vector.broadcast %c25_i32 : i32 to vector<64x1xi32>
    %38 = arith.cmpi eq, %0, %37 : vector<64x1xi32>
    %c1_10 = arith.constant 1 : index
    %c3_11 = arith.constant 3 : index
    %39 = memref.load %arg0[%c1_10, %c3_11] : memref<2x8xi32, #tpu.memory_space<smem>>
    %40 = vector.broadcast %39 : i32 to vector<64x1xi32>
    %41 = arith.select %38, %40, %36 : vector<64x1xi1>, vector<64x1xi32>
    %c32_i32 = arith.constant 32 : i32
    %42 = vector.broadcast %c32_i32 : i32 to vector<64x1xi32>
    %43 = arith.cmpi eq, %0, %42 : vector<64x1xi32>
    %c0_12 = arith.constant 0 : index
    %c4 = arith.constant 4 : index
    %44 = memref.load %arg0[%c0_12, %c4] : memref<2x8xi32, #tpu.memory_space<smem>>
    %45 = vector.broadcast %44 : i32 to vector<64x1xi32>
    %46 = arith.select %43, %45, %41 : vector<64x1xi1>, vector<64x1xi32>
    %c33_i32 = arith.constant 33 : i32
    %47 = vector.broadcast %c33_i32 : i32 to vector<64x1xi32>
    %48 = arith.cmpi eq, %0, %47 : vector<64x1xi32>
    %c1_13 = arith.constant 1 : index
    %c4_14 = arith.constant 4 : index
    %49 = memref.load %arg0[%c1_13, %c4_14] : memref<2x8xi32, #tpu.memory_space<smem>>
    %50 = vector.broadcast %49 : i32 to vector<64x1xi32>
    %51 = arith.select %48, %50, %46 : vector<64x1xi1>, vector<64x1xi32>
    %c40_i32 = arith.constant 40 : i32
    %52 = vector.broadcast %c40_i32 : i32 to vector<64x1xi32>
    %53 = arith.cmpi eq, %0, %52 : vector<64x1xi32>
    %c0_15 = arith.constant 0 : index
    %c5 = arith.constant 5 : index
    %54 = memref.load %arg0[%c0_15, %c5] : memref<2x8xi32, #tpu.memory_space<smem>>
    %55 = vector.broadcast %54 : i32 to vector<64x1xi32>
    %56 = arith.select %53, %55, %51 : vector<64x1xi1>, vector<64x1xi32>
    %c41_i32 = arith.constant 41 : i32
    %57 = vector.broadcast %c41_i32 : i32 to vector<64x1xi32>
    %58 = arith.cmpi eq, %0, %57 : vector<64x1xi32>
    %c1_16 = arith.constant 1 : index
    %c5_17 = arith.constant 5 : index
    %59 = memref.load %arg0[%c1_16, %c5_17] : memref<2x8xi32, #tpu.memory_space<smem>>
    %60 = vector.broadcast %59 : i32 to vector<64x1xi32>
    %61 = arith.select %58, %60, %56 : vector<64x1xi1>, vector<64x1xi32>
    %c48_i32 = arith.constant 48 : i32
    %62 = vector.broadcast %c48_i32 : i32 to vector<64x1xi32>
    %63 = arith.cmpi eq, %0, %62 : vector<64x1xi32>
    %c0_18 = arith.constant 0 : index
    %c6 = arith.constant 6 : index
    %64 = memref.load %arg0[%c0_18, %c6] : memref<2x8xi32, #tpu.memory_space<smem>>
    %65 = vector.broadcast %64 : i32 to vector<64x1xi32>
    %66 = arith.select %63, %65, %61 : vector<64x1xi1>, vector<64x1xi32>
    %c49_i32 = arith.constant 49 : i32
    %67 = vector.broadcast %c49_i32 : i32 to vector<64x1xi32>
    %68 = arith.cmpi eq, %0, %67 : vector<64x1xi32>
    %c1_19 = arith.constant 1 : index
    %c6_20 = arith.constant 6 : index
    %69 = memref.load %arg0[%c1_19, %c6_20] : memref<2x8xi32, #tpu.memory_space<smem>>
    %70 = vector.broadcast %69 : i32 to vector<64x1xi32>
    %71 = arith.select %68, %70, %66 : vector<64x1xi1>, vector<64x1xi32>
    %c56_i32 = arith.constant 56 : i32
    %72 = vector.broadcast %c56_i32 : i32 to vector<64x1xi32>
    %73 = arith.cmpi eq, %0, %72 : vector<64x1xi32>
    %c0_21 = arith.constant 0 : index
    %c7 = arith.constant 7 : index
    %74 = memref.load %arg0[%c0_21, %c7] : memref<2x8xi32, #tpu.memory_space<smem>>
    %75 = vector.broadcast %74 : i32 to vector<64x1xi32>
    %76 = arith.select %73, %75, %71 : vector<64x1xi1>, vector<64x1xi32>
    %c57_i32 = arith.constant 57 : i32
    %77 = vector.broadcast %c57_i32 : i32 to vector<64x1xi32>
    %78 = arith.cmpi eq, %0, %77 : vector<64x1xi32>
    %c1_22 = arith.constant 1 : index
    %c7_23 = arith.constant 7 : index
    %79 = memref.load %arg0[%c1_22, %c7_23] : memref<2x8xi32, #tpu.memory_space<smem>>
    %80 = vector.broadcast %79 : i32 to vector<64x1xi32>
    %81 = arith.select %78, %80, %76 : vector<64x1xi1>, vector<64x1xi32>
    %82 = tpu.iota {dimensions = array<i32: 1>} : vector<64x100xi32>
    %83 = vector.broadcast %81 : vector<64x1xi32> to vector<64x100xi32>
    %84 = arith.cmpi eq, %82, %83 : vector<64x100xi32>
    %85 = arith.extui %84 : vector<64x100xi1> to vector<64x100xi32>
    %86 = arith.sitofp %85 : vector<64x100xi32> to vector<64x100xf32>
    %87 = arith.truncf %86 : vector<64x100xf32> to vector<64x100xbf16>
    %c0_24 = arith.constant 0 : index
    %c0_25 = arith.constant 0 : index
    %88 = vector.load %arg1[%c0_24, %c0_25] : memref<100x64xbf16, #tpu.memory_space<vmem>>, vector<100x64xbf16>
    %cst = arith.constant dense<0.000000e+00> : vector<64x64xf32>
    %89 = tpu.matmul %87, %88, %cst {dimension_numbers = #tpu.dot_dimension_numbers<[1], [0], [0], [1], [0, 0, 1, 1], [], []>} : vector<64x100xbf16>, vector<100x64xbf16>, vector<64x64xf32> -> vector<64x64xf32>
    %90 = arith.truncf %89 : vector<64x64xf32> to vector<64x64xbf16>
    %c0_26 = arith.constant 0 : index
    %c0_27 = arith.constant 0 : index
    %91 = vector.load %arg2[%c0_26, %c0_27] : memref<64x512xbf16, #tpu.memory_space<vmem>>, vector<64x512xbf16>
    %cst_28 = arith.constant dense<0.000000e+00> : vector<64x512xf32>
    %92 = tpu.matmul %90, %91, %cst_28 {dimension_numbers = #tpu.dot_dimension_numbers<[1], [0], [0], [1], [0, 0, 1, 1], [], []>} : vector<64x64xbf16>, vector<64x512xbf16>, vector<64x512xf32> -> vector<64x512xf32>
    %c0_29 = arith.constant 0 : index
    %c0_30 = arith.constant 0 : index
    %93 = vector.load %arg4[%c0_29, %c0_30] : memref<1x512xf32, #tpu.memory_space<vmem>>, vector<1x512xf32>
    %94 = vector.broadcast %93 : vector<1x512xf32> to vector<64x512xf32>
    %95 = arith.addf %92, %94 : vector<64x512xf32>
    %c0_31 = arith.constant 0 : index
    %c0_32 = arith.constant 0 : index
    %96 = vector.load %arg8[%c0_31, %c0_32] : memref<64x512xf32, #tpu.memory_space<vmem>>, vector<64x512xf32>
    tpu.vector_store %arg8[%c0_31, %c0_32], %95 {strides = array<i32>} : memref<64x512xf32, #tpu.memory_space<vmem>>, vector<64x512xf32>,
    %c0_33 = arith.constant 0 : index
    %c0_34 = arith.constant 0 : index
    %97 = vector.load %arg3[%c0_33, %c0_34] : memref<128x512xbf16, #tpu.memory_space<vmem>>, vector<128x512xbf16>
    %cst_35 = arith.constant 0.000000e+00 : f32
    %98 = vector.broadcast %cst_35 : f32 to vector<8x128xf32>
    %cst_36 = arith.constant 0.000000e+00 : f32
    %99 = vector.broadcast %cst_36 : f32 to vector<8x128xf32>
    %c0_37 = arith.constant 0 : index
    %c0_38 = arith.constant 0 : index
    %100 = vector.load %arg8[%c0_37, %c0_38] : memref<64x512xf32, #tpu.memory_space<vmem>>, vector<8x512xf32>
    %101 = arith.truncf %98 : vector<8x128xf32> to vector<8x128xbf16>
    %cst_39 = arith.constant dense<0.000000e+00> : vector<8x512xf32>
    %102 = tpu.matmul %101, %97, %cst_39 {dimension_numbers = #tpu.dot_dimension_numbers<[1], [0], [0], [1], [0, 0, 1, 1], [], []>} : vector<8x128xbf16>, vector<128x512xbf16>, vector<8x512xf32> -> vector<8x512xf32>
    %103 = arith.addf %100, %102 : vector<8x512xf32>
    %104 = vector.extract_strided_slice %103 {offsets = [0, 0], sizes = [8, 256], strides = [1, 1]} : vector<8x512xf32> to vector<8x256xf32>
    %105 = arith.negf %104 : vector<8x256xf32>
    %106 = math.exp %105 : vector<8x256xf32>
    %cst_40 = arith.constant 1.000000e+00 : f32
    %107 = vector.broadcast %cst_40 : f32 to vector<8x256xf32>
    %108 = arith.addf %107, %106 : vector<8x256xf32>
    %109 = arith.divf %107, %108 : vector<8x256xf32>
    %110 = vector.extract_strided_slice %103 {offsets = [0, 256], sizes = [8, 128], strides = [1, 1]} : vector<8x512xf32> to vector<8x128xf32>
    %111 = math.tanh %110 : vector<8x128xf32>
    %112 = vector.extract_strided_slice %103 {offsets = [0, 384], sizes = [8, 128], strides = [1, 1]} : vector<8x512xf32> to vector<8x128xf32>
    %113 = arith.negf %112 : vector<8x128xf32>
    %114 = math.exp %113 : vector<8x128xf32>
    %cst_41 = arith.constant 1.000000e+00 : f32
    %115 = vector.broadcast %cst_41 : f32 to vector<8x128xf32>
    %116 = arith.addf %115, %114 : vector<8x128xf32>
    %117 = arith.divf %115, %116 : vector<8x128xf32>
    %118 = vector.extract_strided_slice %109 {offsets = [0, 128], sizes = [8, 128], strides = [1, 1]} : vector<8x256xf32> to vector<8x128xf32>
    %119 = arith.mulf %118, %99 : vector<8x128xf32>
    %120 = vector.extract_strided_slice %109 {offsets = [0, 0], sizes = [8, 128], strides = [1, 1]} : vector<8x256xf32> to vector<8x128xf32>
    %121 = arith.mulf %120, %111 : vector<8x128xf32>
    %122 = arith.addf %119, %121 : vector<8x128xf32>
    %123 = math.tanh %122 : vector<8x128xf32>
    %124 = arith.mulf %117, %123 : vector<8x128xf32>
    %c8 = arith.constant 8 : index
    %c0_42 = arith.constant 0 : index
    %125 = vector.load %arg8[%c8, %c0_42] : memref<64x512xf32, #tpu.memory_space<vmem>>, vector<8x512xf32>
    %126 = arith.truncf %124 : vector<8x128xf32> to vector<8x128xbf16>
    %cst_43 = arith.constant dense<0.000000e+00> : vector<8x512xf32>
    %127 = tpu.matmul %126, %97, %cst_43 {dimension_numbers = #tpu.dot_dimension_numbers<[1], [0], [0], [1], [0, 0, 1, 1], [], []>} : vector<8x128xbf16>, vector<128x512xbf16>, vector<8x512xf32> -> vector<8x512xf32>
    %128 = arith.addf %125, %127 : vector<8x512xf32>
    %129 = vector.extract_strided_slice %128 {offsets = [0, 0], sizes = [8, 256], strides = [1, 1]} : vector<8x512xf32> to vector<8x256xf32>
    %130 = arith.negf %129 : vector<8x256xf32>
    %131 = math.exp %130 : vector<8x256xf32>
    %cst_44 = arith.constant 1.000000e+00 : f32
    %132 = vector.broadcast %cst_44 : f32 to vector<8x256xf32>
    %133 = arith.addf %132, %131 : vector<8x256xf32>
    %134 = arith.divf %132, %133 : vector<8x256xf32>
    %135 = vector.extract_strided_slice %128 {offsets = [0, 256], sizes = [8, 128], strides = [1, 1]} : vector<8x512xf32> to vector<8x128xf32>
    %136 = math.tanh %135 : vector<8x128xf32>
    %137 = vector.extract_strided_slice %128 {offsets = [0, 384], sizes = [8, 128], strides = [1, 1]} : vector<8x512xf32> to vector<8x128xf32>
    %138 = arith.negf %137 : vector<8x128xf32>
    %139 = math.exp %138 : vector<8x128xf32>
    %cst_45 = arith.constant 1.000000e+00 : f32
    %140 = vector.broadcast %cst_45 : f32 to vector<8x128xf32>
    %141 = arith.addf %140, %139 : vector<8x128xf32>
    %142 = arith.divf %140, %141 : vector<8x128xf32>
    %143 = vector.extract_strided_slice %134 {offsets = [0, 128], sizes = [8, 128], strides = [1, 1]} : vector<8x256xf32> to vector<8x128xf32>
    %144 = arith.mulf %143, %122 : vector<8x128xf32>
    %145 = vector.extract_strided_slice %134 {offsets = [0, 0], sizes = [8, 128], strides = [1, 1]} : vector<8x256xf32> to vector<8x128xf32>
    %146 = arith.mulf %145, %136 : vector<8x128xf32>
    %147 = arith.addf %144, %146 : vector<8x128xf32>
    %148 = math.tanh %147 : vector<8x128xf32>
    %149 = arith.mulf %142, %148 : vector<8x128xf32>
    %c16 = arith.constant 16 : index
    %c0_46 = arith.constant 0 : index
    %150 = vector.load %arg8[%c16, %c0_46] : memref<64x512xf32, #tpu.memory_space<vmem>>, vector<8x512xf32>
    %151 = arith.truncf %149 : vector<8x128xf32> to vector<8x128xbf16>
    %cst_47 = arith.constant dense<0.000000e+00> : vector<8x512xf32>
    %152 = tpu.matmul %151, %97, %cst_47 {dimension_numbers = #tpu.dot_dimension_numbers<[1], [0], [0], [1], [0, 0, 1, 1], [], []>} : vector<8x128xbf16>, vector<128x512xbf16>, vector<8x512xf32> -> vector<8x512xf32>
    %153 = arith.addf %150, %152 : vector<8x512xf32>
    %154 = vector.extract_strided_slice %153 {offsets = [0, 0], sizes = [8, 256], strides = [1, 1]} : vector<8x512xf32> to vector<8x256xf32>
    %155 = arith.negf %154 : vector<8x256xf32>
    %156 = math.exp %155 : vector<8x256xf32>
    %cst_48 = arith.constant 1.000000e+00 : f32
    %157 = vector.broadcast %cst_48 : f32 to vector<8x256xf32>
    %158 = arith.addf %157, %156 : vector<8x256xf32>
    %159 = arith.divf %157, %158 : vector<8x256xf32>
    %160 = vector.extract_strided_slice %153 {offsets = [0, 256], sizes = [8, 128], strides = [1, 1]} : vector<8x512xf32> to vector<8x128xf32>
    %161 = math.tanh %160 : vector<8x128xf32>
    %162 = vector.extract_strided_slice %153 {offsets = [0, 384], sizes = [8, 128], strides = [1, 1]} : vector<8x512xf32> to vector<8x128xf32>
    %163 = arith.negf %162 : vector<8x128xf32>
    %164 = math.exp %163 : vector<8x128xf32>
    %cst_49 = arith.constant 1.000000e+00 : f32
    %165 = vector.broadcast %cst_49 : f32 to vector<8x128xf32>
    %166 = arith.addf %165, %164 : vector<8x128xf32>
    %167 = arith.divf %165, %166 : vector<8x128xf32>
    %168 = vector.extract_strided_slice %159 {offsets = [0, 128], sizes = [8, 128], strides = [1, 1]} : vector<8x256xf32> to vector<8x128xf32>
    %169 = arith.mulf %168, %147 : vector<8x128xf32>
    %170 = vector.extract_strided_slice %159 {offsets = [0, 0], sizes = [8, 128], strides = [1, 1]} : vector<8x256xf32> to vector<8x128xf32>
    %171 = arith.mulf %170, %161 : vector<8x128xf32>
    %172 = arith.addf %169, %171 : vector<8x128xf32>
    %173 = math.tanh %172 : vector<8x128xf32>
    %174 = arith.mulf %167, %173 : vector<8x128xf32>
    %c24 = arith.constant 24 : index
    %c0_50 = arith.constant 0 : index
    %175 = vector.load %arg8[%c24, %c0_50] : memref<64x512xf32, #tpu.memory_space<vmem>>, vector<8x512xf32>
    %176 = arith.truncf %174 : vector<8x128xf32> to vector<8x128xbf16>
    %cst_51 = arith.constant dense<0.000000e+00> : vector<8x512xf32>
    %177 = tpu.matmul %176, %97, %cst_51 {dimension_numbers = #tpu.dot_dimension_numbers<[1], [0], [0], [1], [0, 0, 1, 1], [], []>} : vector<8x128xbf16>, vector<128x512xbf16>, vector<8x512xf32> -> vector<8x512xf32>
    %178 = arith.addf %175, %177 : vector<8x512xf32>
    %179 = vector.extract_strided_slice %178 {offsets = [0, 0], sizes = [8, 256], strides = [1, 1]} : vector<8x512xf32> to vector<8x256xf32>
    %180 = arith.negf %179 : vector<8x256xf32>
    %181 = math.exp %180 : vector<8x256xf32>
    %cst_52 = arith.constant 1.000000e+00 : f32
    %182 = vector.broadcast %cst_52 : f32 to vector<8x256xf32>
    %183 = arith.addf %182, %181 : vector<8x256xf32>
    %184 = arith.divf %182, %183 : vector<8x256xf32>
    %185 = vector.extract_strided_slice %178 {offsets = [0, 256], sizes = [8, 128], strides = [1, 1]} : vector<8x512xf32> to vector<8x128xf32>
    %186 = math.tanh %185 : vector<8x128xf32>
    %187 = vector.extract_strided_slice %178 {offsets = [0, 384], sizes = [8, 128], strides = [1, 1]} : vector<8x512xf32> to vector<8x128xf32>
    %188 = arith.negf %187 : vector<8x128xf32>
    %189 = math.exp %188 : vector<8x128xf32>
    %cst_53 = arith.constant 1.000000e+00 : f32
    %190 = vector.broadcast %cst_53 : f32 to vector<8x128xf32>
    %191 = arith.addf %190, %189 : vector<8x128xf32>
    %192 = arith.divf %190, %191 : vector<8x128xf32>
    %193 = vector.extract_strided_slice %184 {offsets = [0, 128], sizes = [8, 128], strides = [1, 1]} : vector<8x256xf32> to vector<8x128xf32>
    %194 = arith.mulf %193, %172 : vector<8x128xf32>
    %195 = vector.extract_strided_slice %184 {offsets = [0, 0], sizes = [8, 128], strides = [1, 1]} : vector<8x256xf32> to vector<8x128xf32>
    %196 = arith.mulf %195, %186 : vector<8x128xf32>
    %197 = arith.addf %194, %196 : vector<8x128xf32>
    %198 = math.tanh %197 : vector<8x128xf32>
    %199 = arith.mulf %192, %198 : vector<8x128xf32>
    %c32 = arith.constant 32 : index
    %c0_54 = arith.constant 0 : index
    %200 = vector.load %arg8[%c32, %c0_54] : memref<64x512xf32, #tpu.memory_space<vmem>>, vector<8x512xf32>
    %201 = arith.truncf %199 : vector<8x128xf32> to vector<8x128xbf16>
    %cst_55 = arith.constant dense<0.000000e+00> : vector<8x512xf32>
    %202 = tpu.matmul %201, %97, %cst_55 {dimension_numbers = #tpu.dot_dimension_numbers<[1], [0], [0], [1], [0, 0, 1, 1], [], []>} : vector<8x128xbf16>, vector<128x512xbf16>, vector<8x512xf32> -> vector<8x512xf32>
    %203 = arith.addf %200, %202 : vector<8x512xf32>
    %204 = vector.extract_strided_slice %203 {offsets = [0, 0], sizes = [8, 256], strides = [1, 1]} : vector<8x512xf32> to vector<8x256xf32>
    %205 = arith.negf %204 : vector<8x256xf32>
    %206 = math.exp %205 : vector<8x256xf32>
    %cst_56 = arith.constant 1.000000e+00 : f32
    %207 = vector.broadcast %cst_56 : f32 to vector<8x256xf32>
    %208 = arith.addf %207, %206 : vector<8x256xf32>
    %209 = arith.divf %207, %208 : vector<8x256xf32>
    %210 = vector.extract_strided_slice %203 {offsets = [0, 256], sizes = [8, 128], strides = [1, 1]} : vector<8x512xf32> to vector<8x128xf32>
    %211 = math.tanh %210 : vector<8x128xf32>
    %212 = vector.extract_strided_slice %203 {offsets = [0, 384], sizes = [8, 128], strides = [1, 1]} : vector<8x512xf32> to vector<8x128xf32>
    %213 = arith.negf %212 : vector<8x128xf32>
    %214 = math.exp %213 : vector<8x128xf32>
    %cst_57 = arith.constant 1.000000e+00 : f32
    %215 = vector.broadcast %cst_57 : f32 to vector<8x128xf32>
    %216 = arith.addf %215, %214 : vector<8x128xf32>
    %217 = arith.divf %215, %216 : vector<8x128xf32>
    %218 = vector.extract_strided_slice %209 {offsets = [0, 128], sizes = [8, 128], strides = [1, 1]} : vector<8x256xf32> to vector<8x128xf32>
    %219 = arith.mulf %218, %197 : vector<8x128xf32>
    %220 = vector.extract_strided_slice %209 {offsets = [0, 0], sizes = [8, 128], strides = [1, 1]} : vector<8x256xf32> to vector<8x128xf32>
    %221 = arith.mulf %220, %211 : vector<8x128xf32>
    %222 = arith.addf %219, %221 : vector<8x128xf32>
    %223 = math.tanh %222 : vector<8x128xf32>
    %224 = arith.mulf %217, %223 : vector<8x128xf32>
    %c40 = arith.constant 40 : index
    %c0_58 = arith.constant 0 : index
    %225 = vector.load %arg8[%c40, %c0_58] : memref<64x512xf32, #tpu.memory_space<vmem>>, vector<8x512xf32>
    %226 = arith.truncf %224 : vector<8x128xf32> to vector<8x128xbf16>
    %cst_59 = arith.constant dense<0.000000e+00> : vector<8x512xf32>
    %227 = tpu.matmul %226, %97, %cst_59 {dimension_numbers = #tpu.dot_dimension_numbers<[1], [0], [0], [1], [0, 0, 1, 1], [], []>} : vector<8x128xbf16>, vector<128x512xbf16>, vector<8x512xf32> -> vector<8x512xf32>
    %228 = arith.addf %225, %227 : vector<8x512xf32>
    %229 = vector.extract_strided_slice %228 {offsets = [0, 0], sizes = [8, 256], strides = [1, 1]} : vector<8x512xf32> to vector<8x256xf32>
    %230 = arith.negf %229 : vector<8x256xf32>
    %231 = math.exp %230 : vector<8x256xf32>
    %cst_60 = arith.constant 1.000000e+00 : f32
    %232 = vector.broadcast %cst_60 : f32 to vector<8x256xf32>
    %233 = arith.addf %232, %231 : vector<8x256xf32>
    %234 = arith.divf %232, %233 : vector<8x256xf32>
    %235 = vector.extract_strided_slice %228 {offsets = [0, 256], sizes = [8, 128], strides = [1, 1]} : vector<8x512xf32> to vector<8x128xf32>
    %236 = math.tanh %235 : vector<8x128xf32>
    %237 = vector.extract_strided_slice %228 {offsets = [0, 384], sizes = [8, 128], strides = [1, 1]} : vector<8x512xf32> to vector<8x128xf32>
    %238 = arith.negf %237 : vector<8x128xf32>
    %239 = math.exp %238 : vector<8x128xf32>
    %cst_61 = arith.constant 1.000000e+00 : f32
    %240 = vector.broadcast %cst_61 : f32 to vector<8x128xf32>
    %241 = arith.addf %240, %239 : vector<8x128xf32>
    %242 = arith.divf %240, %241 : vector<8x128xf32>
    %243 = vector.extract_strided_slice %234 {offsets = [0, 128], sizes = [8, 128], strides = [1, 1]} : vector<8x256xf32> to vector<8x128xf32>
    %244 = arith.mulf %243, %222 : vector<8x128xf32>
    %245 = vector.extract_strided_slice %234 {offsets = [0, 0], sizes = [8, 128], strides = [1, 1]} : vector<8x256xf32> to vector<8x128xf32>
    %246 = arith.mulf %245, %236 : vector<8x128xf32>
    %247 = arith.addf %244, %246 : vector<8x128xf32>
    %248 = math.tanh %247 : vector<8x128xf32>
    %249 = arith.mulf %242, %248 : vector<8x128xf32>
    %c48 = arith.constant 48 : index
    %c0_62 = arith.constant 0 : index
    %250 = vector.load %arg8[%c48, %c0_62] : memref<64x512xf32, #tpu.memory_space<vmem>>, vector<8x512xf32>
    %251 = arith.truncf %249 : vector<8x128xf32> to vector<8x128xbf16>
    %cst_63 = arith.constant dense<0.000000e+00> : vector<8x512xf32>
    %252 = tpu.matmul %251, %97, %cst_63 {dimension_numbers = #tpu.dot_dimension_numbers<[1], [0], [0], [1], [0, 0, 1, 1], [], []>} : vector<8x128xbf16>, vector<128x512xbf16>, vector<8x512xf32> -> vector<8x512xf32>
    %253 = arith.addf %250, %252 : vector<8x512xf32>
    %254 = vector.extract_strided_slice %253 {offsets = [0, 0], sizes = [8, 256], strides = [1, 1]} : vector<8x512xf32> to vector<8x256xf32>
    %255 = arith.negf %254 : vector<8x256xf32>
    %256 = math.exp %255 : vector<8x256xf32>
    %cst_64 = arith.constant 1.000000e+00 : f32
    %257 = vector.broadcast %cst_64 : f32 to vector<8x256xf32>
    %258 = arith.addf %257, %256 : vector<8x256xf32>
    %259 = arith.divf %257, %258 : vector<8x256xf32>
    %260 = vector.extract_strided_slice %253 {offsets = [0, 256], sizes = [8, 128], strides = [1, 1]} : vector<8x512xf32> to vector<8x128xf32>
    %261 = math.tanh %260 : vector<8x128xf32>
    %262 = vector.extract_strided_slice %253 {offsets = [0, 384], sizes = [8, 128], strides = [1, 1]} : vector<8x512xf32> to vector<8x128xf32>
    %263 = arith.negf %262 : vector<8x128xf32>
    %264 = math.exp %263 : vector<8x128xf32>
    %cst_65 = arith.constant 1.000000e+00 : f32
    %265 = vector.broadcast %cst_65 : f32 to vector<8x128xf32>
    %266 = arith.addf %265, %264 : vector<8x128xf32>
    %267 = arith.divf %265, %266 : vector<8x128xf32>
    %268 = vector.extract_strided_slice %259 {offsets = [0, 128], sizes = [8, 128], strides = [1, 1]} : vector<8x256xf32> to vector<8x128xf32>
    %269 = arith.mulf %268, %247 : vector<8x128xf32>
    %270 = vector.extract_strided_slice %259 {offsets = [0, 0], sizes = [8, 128], strides = [1, 1]} : vector<8x256xf32> to vector<8x128xf32>
    %271 = arith.mulf %270, %261 : vector<8x128xf32>
    %272 = arith.addf %269, %271 : vector<8x128xf32>
    %273 = math.tanh %272 : vector<8x128xf32>
    %274 = arith.mulf %267, %273 : vector<8x128xf32>
    %c56 = arith.constant 56 : index
    %c0_66 = arith.constant 0 : index
    %275 = vector.load %arg8[%c56, %c0_66] : memref<64x512xf32, #tpu.memory_space<vmem>>, vector<8x512xf32>
    %276 = arith.truncf %274 : vector<8x128xf32> to vector<8x128xbf16>
    %cst_67 = arith.constant dense<0.000000e+00> : vector<8x512xf32>
    %277 = tpu.matmul %276, %97, %cst_67 {dimension_numbers = #tpu.dot_dimension_numbers<[1], [0], [0], [1], [0, 0, 1, 1], [], []>} : vector<8x128xbf16>, vector<128x512xbf16>, vector<8x512xf32> -> vector<8x512xf32>
    %278 = arith.addf %275, %277 : vector<8x512xf32>
    %279 = vector.extract_strided_slice %278 {offsets = [0, 0], sizes = [8, 256], strides = [1, 1]} : vector<8x512xf32> to vector<8x256xf32>
    %280 = arith.negf %279 : vector<8x256xf32>
    %281 = math.exp %280 : vector<8x256xf32>
    %cst_68 = arith.constant 1.000000e+00 : f32
    %282 = vector.broadcast %cst_68 : f32 to vector<8x256xf32>
    %283 = arith.addf %282, %281 : vector<8x256xf32>
    %284 = arith.divf %282, %283 : vector<8x256xf32>
    %285 = vector.extract_strided_slice %278 {offsets = [0, 256], sizes = [8, 128], strides = [1, 1]} : vector<8x512xf32> to vector<8x128xf32>
    %286 = math.tanh %285 : vector<8x128xf32>
    %287 = vector.extract_strided_slice %278 {offsets = [0, 384], sizes = [8, 128], strides = [1, 1]} : vector<8x512xf32> to vector<8x128xf32>
    %288 = arith.negf %287 : vector<8x128xf32>
    %289 = math.exp %288 : vector<8x128xf32>
    %cst_69 = arith.constant 1.000000e+00 : f32
    %290 = vector.broadcast %cst_69 : f32 to vector<8x128xf32>
    %291 = arith.addf %290, %289 : vector<8x128xf32>
    %292 = arith.divf %290, %291 : vector<8x128xf32>
    %293 = vector.extract_strided_slice %284 {offsets = [0, 128], sizes = [8, 128], strides = [1, 1]} : vector<8x256xf32> to vector<8x128xf32>
    %294 = arith.mulf %293, %272 : vector<8x128xf32>
    %295 = vector.extract_strided_slice %284 {offsets = [0, 0], sizes = [8, 128], strides = [1, 1]} : vector<8x256xf32> to vector<8x128xf32>
    %296 = arith.mulf %295, %286 : vector<8x128xf32>
    %297 = arith.addf %294, %296 : vector<8x128xf32>
    %298 = math.tanh %297 : vector<8x128xf32>
    %299 = arith.mulf %292, %298 : vector<8x128xf32>
    %300 = arith.truncf %299 : vector<8x128xf32> to vector<8x128xbf16>
    %c0_70 = arith.constant 0 : index
    %c0_71 = arith.constant 0 : index
    %301 = vector.load %arg5[%c0_70, %c0_71] : memref<128x100xbf16, #tpu.memory_space<vmem>>, vector<128x100xbf16>
    %cst_72 = arith.constant dense<0.000000e+00> : vector<8x100xf32>
    %302 = tpu.matmul %300, %301, %cst_72 {dimension_numbers = #tpu.dot_dimension_numbers<[1], [0], [0], [1], [0, 0, 1, 1], [], []>} : vector<8x128xbf16>, vector<128x100xbf16>, vector<8x100xf32> -> vector<8x100xf32>
    %c0_73 = arith.constant 0 : index
    %c0_74 = arith.constant 0 : index
    %303 = vector.load %arg6[%c0_73, %c0_74] : memref<1x100xf32, #tpu.memory_space<vmem>>, vector<1x100xf32>
    %304 = vector.broadcast %303 : vector<1x100xf32> to vector<8x100xf32>
    %305 = arith.addf %302, %304 : vector<8x100xf32>
    %306 = vector.extract_strided_slice %305 {offsets = [0, 0], sizes = [2, 100], strides = [1, 1]} : vector<8x100xf32> to vector<2x100xf32>
    %c0_75 = arith.constant 0 : index
    %c0_76 = arith.constant 0 : index
    %307 = vector.load %arg7[%c0_75, %c0_76] : memref<2x100xf32, #tpu.memory_space<vmem>>, vector<2x100xf32>
    tpu.vector_store %arg7[%c0_75, %c0_76], %306 {strides = array<i32>} : memref<2x100xf32, #tpu.memory_space<vmem>>, vector<2x100xf32>,
    return
  }
}

</mosaic_0001>

<bundles_post_ra>
// kernel: predictive_keyboard_forward.1
= control target key start
LH: loop header
LB: loop body
LE: loop exit
PB: predicated region body
PF: predicated region fallthrough
CT: control target
= control target key end

     0   :  { %12 = vsyncpa [#allocation6], 0  ;;  %s3370_s0 = inlined_call_operand.vmem [shape: s32[2,8], index: 0, kind: input, shape index: {}]   ;;  %s3371_s1 = inlined_call_operand.vmem [shape: bf16[100,64], index: 1, kind: input, shape index: {}]   ;;  %s3372_s2 = inlined_call_operand.vmem [shape: bf16[64,512], index: 2, kind: input, shape index: {}]   ;;  %s3373_s3 = inlined_call_operand.hbm [shape: bf16[128,512], index: 3, kind: input, shape index: {}]   ;;  %s3374_s4 = inlined_call_operand.vmem [shape: f32[1,512], index: 4, kind: input, shape index: {}]   ;;  %s3375_s5 = inlined_call_operand.vmem [shape: bf16[128,100], index: 5, kind: input, shape index: {}]   ;;  %s3376_s6 = inlined_call_operand.vmem [shape: f32[1,100], index: 6, kind: input, shape index: {}]   ;;  %s3377_s7 = inlined_call_operand.hbm [shape: f32[2,100], index: 7, kind: output, shape index: {}]  }
   0x1   :  { %13 = vsyncpa [#allocation4], 0 }
   0x2   :  { %14 = vsyncpa [#allocation5], 0  ;;  %s21_s26 = sshll.u32 %s3370_s0, 4  ;;  %s22_s26 = int_to_ptr.vmem [resolvable:$true] %s21_s26 }
   0x3   :  { %s2511_s27 = scalar_lea.vmem %s22_s26, 32  ;;  %p2516_p1 = scmp.lt.s32.totalorder %s22_s26, %s22_s26 }
   0x4   :  { %p2512_p0 = scmp.ne.s32.totalorder %s22_s26, %s2511_s27  ;;  %p2517_p2 = scmp.lt.s32.totalorder %s2511_s27, %s2511_s27 }
   0x6   :  { %p2518_p3 = por %p2517_p2, %p2516_p1 }
   0x8   :  { %p2519_p4 = pnand %p2518_p3, %p2512_p0 }
   0xa   :  { %2522 = shalt.err (!%p2519_p4)
}
   0xb   :  { %s2573_s28 = smov [#allocation3]   ;;  %s2574_s29 = smov [#allocation7]  }
   0xc   :  { %24 = dma.vmem_to_smem %s22_s26, 32, %s2573_s28, [#allocation6]  }
   0xd   :  { %s34_s30 = sshll.u32 %s2574_s29, 4  ;;  %s2523_s10 = scalar_lea.hbm %s3373_s3, 4096  ;;  %s35_s30 = int_to_ptr.vmem [resolvable:$true] %s34_s30 }
   0xe   :  { %p2524_p5 = scmp.ne.s32.totalorder %s3373_s3, %s2523_s10  ;;  %p2527_p6 = scmp.lt.u32.totalorder %s2523_s10, %s3373_s3 }
  0x10   :  { %p2529_p7 = pnand %p2527_p6, %p2524_p5 }
  0x12   :  { %2532 = shalt.err (!%p2529_p7)
}
  0x13   :  { %s2533_s14 = scalar_lea.vmem %s35_s30, 4096  ;;  %p2538_p9 = scmp.lt.s32.totalorder %s35_s30, %s35_s30 }
  0x14   :  { %p2534_p8 = scmp.ne.s32.totalorder %s35_s30, %s2533_s14  ;;  %p2539_p10 = scmp.lt.s32.totalorder %s2533_s14, %s2533_s14 }
  0x16   :  { %p2540_p11 = por %p2539_p10, %p2538_p9 }
  0x18   :  { %p2541_p12 = pnand %p2540_p11, %p2534_p8 }
  0x1a   :  { %2544 = shalt.err (!%p2541_p12)
}
  0x1b   :  { %s2575_s15 = smov 256   ;;  %s2576_s16 = smov 16  }
  0x1c   :  { %40 = dma.hbm_to_vmem [thread:$0]  %s3373_s3, 4096, %s35_s30, [#allocation4], %s2575_s15, %s2575_s15, %s2576_s16  }
  0x1d   :  { %2567 = dma.done.wait [#allocation6], 32  }
  0x1e   :  { %2568 = vsyncadd [#allocation6], 4294967264 }
  0x1f   :  { %2569 = dma.done.wait [#allocation4], 4096  }
  0x20   :  { %2570 = vsyncadd [#allocation4], 4294963200 }
  0x21   :  { %53 = sfence }
  0x22   :  { %v2264_v0 = vld [vmem:[%s3371_s1] sm:$0xff]   ;;  %v55_v1 = vlaneseq  ;;  %v2265_v2 = vld [vmem:[%s3371_s1 + $0x8] sm:$0xff]   ;;  %v2266_v4 = vld [vmem:[%s3371_s1 + $0x10] sm:$0xff]   ;;  %vm447_vm0 = vcmask 1041408   ;;  %s2659_s28 = sld [smem:[#allocation3]]  ;;  %s2664_s30 = sld [smem:[#allocation3 + $0x1]] }
  0x23   :  { %2213 = vmatprep.subr.bf16.mxu0 %v2264_v0  ;;  %v2267_v6 = vld [vmem:[%s3371_s1 + $0x18] sm:$0xff]   ;;  %v2654_v7 = vld [vmem:[%s3371_s1 + $0x30] ss:$0 sps:$4 sm:$0x33]   ;;  %s2662_s29 = sld [smem:[#allocation3 + $0x80]]  ;;  %s2666_s8 = sld [smem:[#allocation3 + $0x81]] }
  0x24   :  { %v2642_v3 = vshrl.u32 %v55_v1, 7  ;;  %2214 = vmatpush3.bf16.msra.mxu0 %v2264_v0  ;;  %v2656_v8 = vand.u32 127, %v55_v1  ;;  %s2670_s9 = sld [smem:[#allocation3 + $0x2]]  ;;  %v2268_v11 = vld [vmem:[%s3371_s1 + $0x20] sm:$0xff]   ;;  %s2677_s0 = sld [smem:[#allocation3 + $0x3]]  ;;  %v2689_v14 = vsel %vm447_vm0, %v2654_v7, 0 }
  0x25   :  { %2215 = vmatprep.subr.bf16.mxu0 %v2265_v2  ;;  %s2672_s10 = sld [smem:[#allocation3 + $0x82]]  ;;  %s2679_s13 = sld [smem:[#allocation3 + $0x83]]  ;;  %vm434_vm5 = vcmask 818176   ;;  %v2269_v17 = vld [vmem:[%s3371_s1 + $0x28] sm:$0xff]   ;;  %v2271_v29 = vld [vmem:[%s3372_s2 + $0x4] ss:$16 sps:$4 sm:$0xff]  }
  0x26   :  { %v57_v5 = vadd.s32 8, %v2642_v3  ;;  %vm64_vm1 = vcmp.eq.s32.totalorder %v2642_v3, 0  ;;  %vm82_vm2 = vcmp.eq.s32.totalorder %v2642_v3, 1  ;;  %v58_v9 = vadd.s32 16, %v2642_v3  ;;  %s2691_s14 = sld [smem:[#allocation3 + $0x4]]  ;;  %s2700_s16 = sld [smem:[#allocation3 + $0x5]]  ;;  %651 = vmatprep.subr.bf16.mxu1 %v2271_v29 }
  0x27   :  { %v59_v10 = vadd.s32 24, %v2642_v3  ;;  %v2682_v12 = vadd.s32 32, %v2642_v3  ;;  %v2685_v13 = vadd.s32 40, %v2642_v3  ;;  %s2695_s15 = sld [smem:[#allocation3 + $0x84]]  ;;  %s2703_s17 = sld [smem:[#allocation3 + $0x85]]  ;;  %v2713_v21 = vadd.s32 48, %v2642_v3 }
  0x28   :  { %2216 = vmatpush3.bf16.msra.mxu0 %v2265_v2  ;;  %vm101_vm3 = vcmp.eq.s32.totalorder %v57_v5, 8  ;;  %vm119_vm4 = vcmp.eq.s32.totalorder %v57_v5, 9  ;;  %vm138_vm6 = vcmp.eq.s32.totalorder %v58_v9, 16  ;;  %vm156_vm7 = vcmp.eq.s32.totalorder %v58_v9, 17  ;;  %s2715_s20 = sld [smem:[#allocation3 + $0x6]]  ;;  %s2724_s21 = sld [smem:[#allocation3 + $0x7]] }
  0x29   :  { %2217 = vmatprep.subr.bf16.mxu0 %v2266_v4  ;;  %vm175_vm8 = vcmp.eq.s32.totalorder %v59_v10, 24  ;;  %vm193_vm9 = vcmp.eq.s32.totalorder %v59_v10, 25  ;;  %vm212_vm10 = vcmp.eq.s32.totalorder %v2682_v12, 32  ;;  %vm230_vm11 = vcmp.eq.s32.totalorder %v2682_v12, 33  ;;  %s2722_s1 = sld [smem:[#allocation3 + $0x86]]  ;;  %s2744_s25 = sld [smem:[#allocation3 + $0x87]] }
  0x2a   :  { %v73_v15 = vstv %s2659_s28  ;;  %v91_v16 = vstv %s2662_s29  ;;  %vm249_vm12 = vcmp.eq.s32.totalorder %v2685_v13, 40  ;;  %vm267_vm13 = vcmp.eq.s32.totalorder %v2685_v13, 41  ;;  %v2273_v30 = vld [vmem:[%s3372_s2] ss:$16 sps:$4 sm:$0xff]   ;;  %v2277_v42 = vld [vmem:[%s3372_s2 + $0x24] ss:$16 sps:$4 sm:$0xff]  }
  0x2b   :  { %v74_v18 = vsel %vm64_vm1, %v73_v15, 4294967295  ;;  %v109_v19 = vstv %s2664_s30  ;;  %v127_v20 = vstv %s2666_s8  ;;  %v145_v24 = vstv %s2670_s9  ;;  %652 = vmatpush1.bf16.msra.mxu1 %v2273_v30  ;;  %v2279_v43 = vld [vmem:[%s3372_s2 + $0x20] ss:$16 sps:$4 sm:$0xff]   ;;  %v2849_v30 = vld [vmem:[#allocation7 + $0x28] ss:$16 sps:$4 sm:$0xff]  }
  0x2c   :  { %2218 = vmatpush3.bf16.msra.mxu0 %v2266_v4  ;;  %v92_v22 = vsel %vm82_vm2, %v91_v16, %v74_v18  ;;  %v111_v23 = vsel %vm101_vm3, %v109_v19, 4294967295  ;;  %v163_v25 = vstv %s2672_s10  ;;  %v148_v27 = vsel %vm138_vm6, %v145_v24, 4294967295  ;;  %653 = vmatprep.subr.bf16.mxu1 %v2277_v42  ;;  %v2276_v53 = vld [vmem:[%s3372_s2 + $0xc] ss:$16 sps:$4 sm:$0xff]   ;;  %v2283_v56 = vld [vmem:[%s3372_s2 + $0x44] ss:$16 sps:$4 sm:$0xff]  }
  0x2d   :  { %2219 = vmatprep.subr.bf16.mxu0 %v2267_v6  ;;  %v129_v26 = vsel %vm119_vm4, %v127_v20, %v111_v23  ;;  %vm354_vm14 = vcmp.eq.s32.totalorder %v2656_v8, %v92_v22  ;;  %v181_v28 = vstv %s2677_s0  ;;  %v3378_v31 = vmov 0.0   ;;  %v2285_v60 = vld [vmem:[%s3372_s2 + $0x40] ss:$16 sps:$4 sm:$0xff]   ;;  %v2274_v63 = vld [vmem:[%s3372_s2 + $0x8] ss:$16 sps:$4 sm:$0xff]  }
  0x2e   :  { %vm355_vm15 = vcmp.eq.s32.totalorder %v2656_v8, %v129_v26  ;;  %v2085_v32 = vsel %vm354_vm14, 1.0, %v3378_v31  ;;  %v166_v33 = vsel %vm156_vm7, %v163_v25, %v148_v27  ;;  %v185_v34 = vsel %vm175_vm8, %v181_v28, 4294967295  ;;  %v2282_v2 = vld [vmem:[%s3372_s2 + $0x2c] ss:$16 sps:$4 sm:$0xff]   ;;  %v2289_v12 = vld [vmem:[%s3372_s2 + $0x64] ss:$16 sps:$4 sm:$0xff]  }
  0x2f   :  { %v2086_v35 = vsel %vm355_vm15, 1.0, %v3378_v31  ;;  %v199_v36 = vstv %s2679_s13  ;;  %vm356_vm1 = vcmp.eq.s32.totalorder %v2656_v8, %v166_v33  ;;  %v217_v37 = vstv %s2691_s14  ;;  %654 = vmatpush1.bf16.msra.mxu1 %v2279_v43  ;;  %v2294_v13 = vld [vmem:[%s3372_s2 + $0x6c] ss:$16 sps:$4 sm:$0xff]   ;;  %v2292_v15 = vld [vmem:[%s3372_s2 + $0x68] ss:$16 sps:$4 sm:$0xff]  }
  0x30   :  { %2220 = vmatpush3.bf16.msra.mxu0 %v2267_v6  ;;  %v378_v38 = vpack.c.bf16 %v2086_v35, %v2085_v32  ;;  %v203_v39 = vsel %vm193_vm9, %v199_v36, %v185_v34  ;;  %v222_v40 = vsel %vm212_vm10, %v217_v37, 4294967295  ;;  %v63_v41 = vadd.s32 56, %v2642_v3  ;;  %655 = vmatprep.subr.bf16.mxu1 %v2283_v56  ;;  %v2280_v6 = vld [vmem:[%s3372_s2 + $0x28] ss:$16 sps:$4 sm:$0xff]   ;;  %v2827_v16 = vld [vmem:[#allocation7 + $0x4] ss:$16 sps:$4 sm:$0xff]  }
  0x31   :  { %2221 = vmatprep.subr.bf16.mxu0 %v2268_v11  ;;  %vm357_vm2 = vcmp.eq.s32.totalorder %v2656_v8, %v203_v39  ;;  %v235_v44 = vstv %s2695_s15  ;;  %v253_v45 = vstv %s2700_s16  ;;  %v271_v46 = vstv %s2703_s17  ;;  %v2835_v24 = vld [vmem:[#allocation7] ss:$16 sps:$4 sm:$0xff]   ;;  %v2837_v25 = vld [vmem:[#allocation7 + $0x8] ss:$16 sps:$4 sm:$0xff]   ;;  %v2839_v27 = vld [vmem:[#allocation7 + $0x24] ss:$16 sps:$4 sm:$0xff]  }
  0x32   :  { %2227 = vmatprep.mubr.msk.bf16.mxu0 %vm434_vm5, %v378_v38  ;;  %v2087_v47 = vsel %vm356_vm1, 1.0, %v3378_v31  ;;  %v240_v48 = vsel %vm230_vm11, %v235_v44, %v222_v40  ;;  %v259_v49 = vsel %vm249_vm12, %v253_v45, 4294967295  ;;  %vm286_vm3 = vcmp.eq.s32.totalorder %v2713_v21, 48  ;;  %v2841_v28 = vld [vmem:[#allocation7 + $0x2c] ss:$16 sps:$4 sm:$0xff]  }
  0x33   :  { %v2088_v50 = vsel %vm357_vm2, 1.0, %v3378_v31  ;;  %v277_v51 = vsel %vm267_vm13, %v271_v46, %v259_v49  ;;  %vm358_vm4 = vcmp.eq.s32.totalorder %v2656_v8, %v240_v48  ;;  %v289_v52 = vstv %s2715_s20  ;;  %656 = vmatpush1.bf16.msra.mxu1 %v2285_v60  ;;  %v2847_v29 = vld [vmem:[#allocation7 + $0x20] ss:$16 sps:$4 sm:$0xff]   ;;  %v2853_v33 = vld [vmem:[#allocation7 + $0x44] ss:$16 sps:$4 sm:$0xff]  }
  0x34   :  { %2222 = vmatpush3.bf16.msra.mxu0 %v2268_v11  ;;  %vm359_vm6 = vcmp.eq.s32.totalorder %v2656_v8, %v277_v51  ;;  %v2089_v54 = vsel %vm358_vm4, 1.0, %v3378_v31  ;;  %v296_v55 = vsel %vm286_vm3, %v289_v52, 4294967295  ;;  %vm304_vm7 = vcmp.eq.s32.totalorder %v2713_v21, 49  ;;  %657 = vmatprep.subr.bf16.mxu1 %v2289_v12  ;;  %v2855_v34 = vld [vmem:[#allocation7 + $0x4c] ss:$16 sps:$4 sm:$0xff]  }
  0x35   :  { %2223 = vmatprep.subr.bf16.mxu0 %v2269_v17  ;;  %v2090_v57 = vsel %vm359_vm6, 1.0, %v3378_v31  ;;  %v307_v58 = vstv %s2722_s1  ;;  %vm323_vm8 = vcmp.eq.s32.totalorder %v63_v41, 56  ;;  %v325_v59 = vstv %s2724_s21  ;;  %v2861_v37 = vld [vmem:[#allocation7 + $0x40] ss:$16 sps:$4 sm:$0xff]   ;;  %v2863_v39 = vld [vmem:[#allocation7 + $0x48] ss:$16 sps:$4 sm:$0xff]  }
  0x36   :  { %v314_v61 = vsel %vm304_vm7, %v307_v58, %v296_v55  ;;  %v333_v62 = vsel %vm323_vm8, %v325_v59, 4294967295  ;;  %vm341_vm9 = vcmp.eq.s32.totalorder %v63_v41, 57  ;;  %v379_v0 = vpack.c.bf16 %v2088_v50, %v2087_v47  ;;  %v2867_v42 = vld [vmem:[#allocation7 + $0x64] ss:$16 sps:$4 sm:$0xff]   ;;  %v2869_v43 = vld [vmem:[#allocation7 + $0x6c] ss:$16 sps:$4 sm:$0xff]  }
  0x37   :  { %v343_v1 = vstv %s2744_s25  ;;  %v380_v4 = vpack.c.bf16 %v2090_v57, %v2089_v54  ;;  %v3380_v18 = vmov 0   ;;  %v2875_v44 = vld [vmem:[#allocation7 + $0x60] ss:$16 sps:$4 sm:$0xff]   ;;  %v2877_v45 = vld [vmem:[#allocation7 + $0x68] ss:$16 sps:$4 sm:$0xff]   ;;  %vm2579_vm11 = vmmov 0  }
  0x38   :  { %2224 = vmatpush3.bf16.msra.mxu0 %v2269_v17  ;;  %v351_v5 = vsel %vm341_vm9, %v343_v1, %v333_v62  ;;  %v2829_v17 = vld [vmem:[#allocation7 + $0xc] ss:$16 sps:$4 sm:$0xff]   ;;  %683 = vmatprep.mubr.bf16.mxu1 %v3380_v18  ;;  %v2881_v46 = vld [vmem:[#allocation7 + $0x84] ss:$16 sps:$4 sm:$0xff]   ;;  %v2889_v48 = vld [vmem:[#allocation7 + $0x80] ss:$16 sps:$4 sm:$0xff]  }
  0x39   :  { %2255 = vmatprep.subr.msk.bf16.mxu0 %vm447_vm0, %v2654_v7  ;;  %vm360_vm0 = vcmp.eq.s32.totalorder %v2656_v8, %v314_v61  ;;  %vm361_vm10 = vcmp.eq.s32.totalorder %v2656_v8, %v351_v5  ;;  %v2288_v7 = vld [vmem:[%s3372_s2 + $0x4c] ss:$16 sps:$4 sm:$0xff]   ;;  %v2286_v8 = vld [vmem:[%s3372_s2 + $0x48] ss:$16 sps:$4 sm:$0xff]   ;;  %v2895_v50 = vld [vmem:[#allocation7 + $0xa4] ss:$16 sps:$4 sm:$0xff]  }
  0x3a   :  { %v2091_v9 = vsel %vm360_vm0, 1.0, %v3378_v31  ;;  %v2092_v10 = vsel %vm361_vm10, 1.0, %v3378_v31  ;;  %v2883_v47 = vld [vmem:[#allocation7 + $0x8c] ss:$16 sps:$4 sm:$0xff]   ;;  %v2891_v49 = vld [vmem:[#allocation7 + $0x88] ss:$16 sps:$4 sm:$0xff]  }
  0x3b   :  { %v381_v11 = vpack.c.bf16 %v2092_v10, %v2091_v9  ;;  %v2897_v51 = vld [vmem:[#allocation7 + $0xac] ss:$16 sps:$4 sm:$0xff]   ;;  %v2903_v52 = vld [vmem:[#allocation7 + $0xa0] ss:$16 sps:$4 sm:$0xff]   ;;  %v2909_v54 = vld [vmem:[#allocation7 + $0xc4] ss:$16 sps:$4 sm:$0xff]  }
  0x3c   :  { %2226 = vmatpush3.bf16.msra.mxu0 %v2689_v14  ;;  %v2291_v14 = vld [vmem:[%s3372_s2 + $0x60] ss:$16 sps:$4 sm:$0xff]   ;;  %v2911_v55 = vld [vmem:[#allocation7 + $0xcc] ss:$16 sps:$4 sm:$0xff]   ;;  %v2919_v57 = vld [vmem:[#allocation7 + $0xc8] ss:$16 sps:$4 sm:$0xff]  }
  0x3d   :  { %724 = vmatprep.subr.bf16.mxu0 %v2276_v53  ;;  %658 = vmatpush1.bf16.msra.mxu1 %v2291_v14  ;;  %v2905_v53 = vld [vmem:[#allocation7 + $0xa8] ss:$16 sps:$4 sm:$0xff]   ;;  %v2917_v56 = vld [vmem:[#allocation7 + $0xc0] ss:$16 sps:$4 sm:$0xff]   ;;  %v2923_v58 = vld [vmem:[#allocation7 + $0xe4] ss:$16 sps:$4 sm:$0xff]  }
  0x3e   :  { %1025 = vmatprep.subr.bf16.mxu1 %v2827_v16  ;;  %v2925_v59 = vld [vmem:[#allocation7 + $0xec] ss:$16 sps:$4 sm:$0xff]   ;;  %v2931_v60 = vld [vmem:[#allocation7 + $0xe0] ss:$16 sps:$4 sm:$0xff]   ;;  %v2933_v61 = vld [vmem:[#allocation7 + $0xe8] ss:$16 sps:$4 sm:$0xff]  }
  0x3f   :  { %2228 = vmatmul.mubr.msk.bf16.vlgmr.msra.gmra.mrb[0].mxu0 %vm434_vm5, %v379_v0  ;;  %v540_v62 = vsub.s32 0, %v2642_v3  ;;  %v536_v0 = vld [vmem:[%s3374_s4] sm:$0xf]  ;;  %v544_v1 = vsub.s32 1, %v2642_v3  ;;  %s2580_s1 = smov [#allocation8]   ;;  %vm2052_vm12 = vcmask 812032  }
  0x40   :  { %2231 = vmatprep.mubr.msk.bf16.mxu0 %vm434_vm5, %v380_v4  ;;  %725 = vmatpush1.bf16.msra.mxu0 %v2274_v63  ;;  %v548_v63 = vsub.s32 2, %v2642_v3  ;;  %s2060_s21 = sshll.u32 %s2580_s1, 4  ;;  %s2061_s21 = int_to_ptr.vmem [resolvable:$true] %s2060_s21 }
  0x41   :  { %726 = vmatprep.subr.bf16.mxu0 %v2282_v2  ;;  %v552_v2 = vsub.s32 3, %v2642_v3  ;;  %s2545_s22 = scalar_lea.vmem %s2061_s21, 32  ;;  %p2550_p0 = scmp.lt.s32.totalorder %s2061_s21, %s2061_s21 }
  0x42   :  { %p2546_p13 = scmp.ne.s32.totalorder %s2061_s21, %s2545_s22  ;;  %p2551_p1 = scmp.lt.s32.totalorder %s2545_s22, %s2545_s22 }
  0x44   :  { %727 = vmatpush1.bf16.msra.mxu0 %v2280_v6  ;;  %v541_v6 = vrot.slane %v536_v0, %v540_v62  ;;  %p2552_p2 = por %p2551_p1, %p2550_p0 }
  0x45   :  { %728 = vmatprep.subr.bf16.mxu0 %v2288_v7  ;;  %v549_v7 = vrot.slane %v536_v0, %v548_v63 }
  0x46   :  { %p2553_p3 = pnand %p2552_p2, %p2546_p13 }
  0x47   :  { %2232 = vmatmul.mubr.msk.bf16.gmra.mrb[4].mxu0 %vm434_vm5, %v381_v11  ;;  %vm638_vm5 = vcmask 523264   ;;  %v553_v11 = vrot.slane %v536_v0, %v552_v2 }
  0x48   :  { %729 = vmatpush1.bf16.msra.mxu0 %v2286_v8  ;;  %756 = vmatprep.mubr.bf16.mxu0 %v3380_v18  ;;  %v545_v8 = vrot.slane %v536_v0, %v544_v1 }
  0x49   :  { %730 = vmatprep.subr.bf16.mxu0 %v2294_v13 }
  0x4c   :  { %731 = vmatpush1.bf16.msra.mxu0 %v2292_v15 }
  0x4d   :  { %1066 = vmatprep.subr.bf16.mxu0 %v2829_v17 }
 0x112   :  { %v2229_v19 = vpop.f32.mrb[0].mxu0 }
 0x113   :  { %v485_v20 = vpop.f32.mrb[1].mxu0 }
 0x114   :  { %v2230_v21 = vpop.f32.mrb[2].mxu0 }
 0x115   :  { %v517_v22 = vpack.c.bf16 %v2230_v21, %v2229_v19  ;;  %v488_v23 = vpop.f32.mrb[3].mxu0 }
 0x116   :  { %v516_v26 = vpack.c.bf16 %v488_v23, %v485_v20 }
 0x118   :  { %2120 = vmatmul.mubr.msk.bf16.vlgmr.msra.gmra.mrb[0].mxu1 %vm638_vm5, %v516_v26  ;;  %2124 = vmatmul.mubr.msk.bf16.vlgmr.msra.gmra.mrb[8].mxu0 %vm638_vm5, %v516_v26 }
 0x119   :  { %1026 = vmatpush1.bf16.msra.mxu1 %v2835_v24  ;;  %1067 = vmatpush1.bf16.msra.mxu0 %v2837_v25 }
 0x11a   :  { %1027 = vmatprep.subr.bf16.mxu1 %v2839_v27  ;;  %1068 = vmatprep.subr.bf16.mxu0 %v2841_v28  ;;  %v2233_v32 = vpop.f32.mrb[4].mxu0 }
 0x11b   :  { %693 = vmatprep.mubr.bf16.mxu1 %v3380_v18  ;;  %766 = vmatprep.mubr.bf16.mxu0 %v3380_v18  ;;  %v501_v35 = vpop.f32.mrb[5].mxu0 }
 0x11c   :  { %v2234_v36 = vpop.f32.mrb[6].mxu0 }
 0x11d   :  { %1028 = vmatpush1.bf16.msra.mxu1 %v2847_v29  ;;  %1069 = vmatpush1.bf16.msra.mxu0 %v2849_v30  ;;  %v519_v38 = vpack.c.bf16 %v2234_v36, %v2233_v32  ;;  %v504_v40 = vpop.f32.mrb[7].mxu0 }
 0x11e   :  { %1029 = vmatprep.subr.bf16.mxu1 %v2853_v33  ;;  %1070 = vmatprep.subr.bf16.mxu0 %v2855_v34  ;;  %v518_v41 = vpack.c.bf16 %v504_v40, %v501_v35 }
 0x120   :  { %2121 = vmatmul.mubr.msk.bf16.gmra.mrb[4].mxu1 %vm638_vm5, %v517_v22  ;;  %2125 = vmatmul.mubr.msk.bf16.gmra.mrb[12].mxu0 %vm638_vm5, %v517_v22 }
 0x121   :  { %1030 = vmatpush1.bf16.msra.mxu1 %v2861_v37  ;;  %1071 = vmatpush1.bf16.msra.mxu0 %v2863_v39 }
 0x122   :  { %1031 = vmatprep.subr.bf16.mxu1 %v2867_v42  ;;  %1072 = vmatprep.subr.bf16.mxu0 %v2869_v43 }
 0x123   :  { %703 = vmatprep.mubr.bf16.mxu1 %v3380_v18  ;;  %776 = vmatprep.mubr.bf16.mxu0 %v3380_v18 }
 0x125   :  { %1032 = vmatpush1.bf16.msra.mxu1 %v2875_v44  ;;  %1073 = vmatpush1.bf16.msra.mxu0 %v2877_v45 }
 0x126   :  { %1033 = vmatprep.subr.bf16.mxu1 %v2881_v46  ;;  %1074 = vmatprep.subr.bf16.mxu0 %v2883_v47 }
 0x128   :  { %2122 = vmatmul.mubr.msk.bf16.gmra.mrb[8].mxu1 %vm638_vm5, %v518_v41  ;;  %2126 = vmatmul.mubr.msk.bf16.gmra.mrb[16].mxu0 %vm638_vm5, %v518_v41 }
 0x129   :  { %1034 = vmatpush1.bf16.msra.mxu1 %v2889_v48  ;;  %1075 = vmatpush1.bf16.msra.mxu0 %v2891_v49 }
 0x12a   :  { %1035 = vmatprep.subr.bf16.mxu1 %v2895_v50  ;;  %1076 = vmatprep.subr.bf16.mxu0 %v2897_v51 }
 0x12b   :  { %713 = vmatprep.mubr.bf16.mxu1 %v3380_v18  ;;  %786 = vmatprep.mubr.bf16.mxu0 %v3380_v18 }
 0x12d   :  { %1036 = vmatpush1.bf16.msra.mxu1 %v2903_v52  ;;  %1077 = vmatpush1.bf16.msra.mxu0 %v2905_v53 }
 0x12e   :  { %1037 = vmatprep.subr.bf16.mxu1 %v2909_v54  ;;  %1078 = vmatprep.subr.bf16.mxu0 %v2911_v55 }
 0x130   :  { %2123 = vmatmul.mubr.msk.bf16.gmra.mrb[12].mxu1 %vm638_vm5, %v519_v38  ;;  %2127 = vmatmul.mubr.msk.bf16.gmra.mrb[20].mxu0 %vm638_vm5, %v519_v38 }
 0x131   :  { %1038 = vmatpush1.bf16.msra.mxu1 %v2917_v56  ;;  %1079 = vmatpush1.bf16.msra.mxu0 %v2919_v57 }
 0x132   :  { %1039 = vmatprep.subr.bf16.mxu1 %v2923_v58  ;;  %1080 = vmatprep.subr.bf16.mxu0 %v2925_v59 }
 0x133   :  { %1057 = vmatprep.mubr.bf16.mxu1 %v3380_v18  ;;  %1098 = vmatprep.mubr.bf16.mxu0 %v3380_v18 }
 0x135   :  { %1040 = vmatpush1.bf16.msra.mxu1 %v2931_v60  ;;  %1081 = vmatpush1.bf16.msra.mxu0 %v2933_v61 }
 0x136   :  { %1140 = vmatprep.subr.bf16.mxu1 %v2827_v16  ;;  %1181 = vmatprep.subr.bf16.mxu0 %v2829_v17 }
 0x138   :  { %1058 = vmatmul.mubr.bf16.vlgmr.msra.gmra.mrb[16].mxu1 %v3380_v18  ;;  %1099 = vmatmul.mubr.bf16.vlgmr.msra.gmra.mrb[24].mxu0 %v3380_v18 }
 0x139   :  { %1141 = vmatpush1.bf16.msra.mxu1 %v2835_v24  ;;  %1182 = vmatpush1.bf16.msra.mxu0 %v2837_v25 }
 0x13a   :  { %1142 = vmatprep.subr.bf16.mxu1 %v2839_v27  ;;  %1183 = vmatprep.subr.bf16.mxu0 %v2841_v28 }
 0x13b   :  { %1172 = vmatprep.mubr.bf16.mxu1 %v3380_v18  ;;  %1213 = vmatprep.mubr.bf16.mxu0 %v3380_v18 }
 0x13d   :  { %1143 = vmatpush1.bf16.msra.mxu1 %v2847_v29  ;;  %1184 = vmatpush1.bf16.msra.mxu0 %v2849_v30 }
 0x13e   :  { %1144 = vmatprep.subr.bf16.mxu1 %v2853_v33  ;;  %1185 = vmatprep.subr.bf16.mxu0 %v2855_v34 }
 0x141   :  { %1145 = vmatpush1.bf16.msra.mxu1 %v2861_v37  ;;  %1186 = vmatpush1.bf16.msra.mxu0 %v2863_v39 }
 0x142   :  { %1146 = vmatprep.subr.bf16.mxu1 %v2867_v42  ;;  %1187 = vmatprep.subr.bf16.mxu0 %v2869_v43 }
 0x145   :  { %1147 = vmatpush1.bf16.msra.mxu1 %v2875_v44  ;;  %1188 = vmatpush1.bf16.msra.mxu0 %v2877_v45 }
 0x146   :  { %1148 = vmatprep.subr.bf16.mxu1 %v2881_v46  ;;  %1189 = vmatprep.subr.bf16.mxu0 %v2883_v47 }
 0x149   :  { %1149 = vmatpush1.bf16.msra.mxu1 %v2889_v48  ;;  %1190 = vmatpush1.bf16.msra.mxu0 %v2891_v49 }
 0x14a   :  { %1150 = vmatprep.subr.bf16.mxu1 %v2895_v50  ;;  %1191 = vmatprep.subr.bf16.mxu0 %v2897_v51 }
 0x14d   :  { %1151 = vmatpush1.bf16.msra.mxu1 %v2903_v52  ;;  %1192 = vmatpush1.bf16.msra.mxu0 %v2905_v53 }
 0x14e   :  { %1152 = vmatprep.subr.bf16.mxu1 %v2909_v54  ;;  %1193 = vmatprep.subr.bf16.mxu0 %v2911_v55 }
 0x151   :  { %1153 = vmatpush1.bf16.msra.mxu1 %v2917_v56  ;;  %1194 = vmatpush1.bf16.msra.mxu0 %v2919_v57 }
 0x152   :  { %1154 = vmatprep.subr.bf16.mxu1 %v2923_v58  ;;  %1195 = vmatprep.subr.bf16.mxu0 %v2925_v59 }
 0x155   :  { %1155 = vmatpush1.bf16.msra.mxu1 %v2931_v60  ;;  %1196 = vmatpush1.bf16.msra.mxu0 %v2933_v61 }
 0x156   :  { %1255 = vmatprep.subr.bf16.mxu1 %v2827_v16  ;;  %1296 = vmatprep.subr.bf16.mxu0 %v2829_v17 }
 0x1eb   :  { %v2986_v4 = vpop.f32.mrb[0].mxu1  ;;  %v2988_v5 = vpop.f32.mrb[8].mxu0 }
 0x1ec   :  { %v687_v9 = vpop.f32.mrb[1].mxu1  ;;  %v760_v10 = vpop.f32.mrb[9].mxu0 }
 0x1ed   :  { %v689_v12 = vpop.f32.mrb[2].mxu1  ;;  %v762_v13 = vpop.f32.mrb[10].mxu0 }
 0x1ee   :  { %v2990_v14 = vadd.f32 %v689_v12, %v541_v6  ;;  %v2992_v15 = vadd.f32 %v762_v13, %v549_v7  ;;  %v691_v19 = vpop.f32.mrb[3].mxu1  ;;  %v764_v20 = vpop.f32.mrb[11].mxu0 }
 0x1ef   :  { %v2994_v21 = vadd.f32 %v691_v19, %v545_v8  ;;  %v2996_v3 = vadd.f32 %v764_v20, %v553_v11 }
 0x1f3   :  { %v695_v22 = vpop.f32.mrb[4].mxu1  ;;  %v768_v23 = vpop.f32.mrb[12].mxu0 }
 0x1f4   :  { %v2998_v26 = vadd.f32 %v695_v22, %v541_v6  ;;  %v3000_v32 = vadd.f32 %v768_v23, %v549_v7  ;;  %v697_v35 = vpop.f32.mrb[5].mxu1  ;;  %v770_v36 = vpop.f32.mrb[13].mxu0 }
 0x1f5   :  { %v3002_v38 = vadd.f32 %v697_v35, %v545_v8  ;;  %v3004_v40 = vadd.f32 %v770_v36, %v553_v11  ;;  %v699_v41 = vpop.f32.mrb[6].mxu1  ;;  %v772_v62 = vpop.f32.mrb[14].mxu0 }
 0x1f6   :  { %v3006_v63 = vadd.f32 %v699_v41, %v541_v6  ;;  %v3008_v0 = vadd.f32 %v772_v62, %v549_v7  ;;  %v701_v1 = vpop.f32.mrb[7].mxu1  ;;  %v774_v2 = vpop.f32.mrb[15].mxu0 }
 0x1f7   :  { %3382 = vst [vmem:[#allocation12_spill] sm:$0xff] %v3002_v38  ;;  %3383 = vst [vmem:[#allocation13_spill] sm:$0xff] %v3004_v40  ;;  %v3010_v12 = vadd.f32 %v701_v1, %v545_v8  ;;  %v3012_v13 = vadd.f32 %v774_v2, %v553_v11 }
 0x1f8   :  { %3384 = vst [vmem:[#allocation14_spill] sm:$0xff] %v3006_v63  ;;  %3385 = vst [vmem:[#allocation15_spill] sm:$0xff] %v3008_v0 }
 0x1f9   :  { %3386 = vst [vmem:[#allocation16_spill] sm:$0xff] %v3010_v12  ;;  %3387 = vst [vmem:[#allocation17_spill] sm:$0xff] %v3012_v13 }
 0x1fb   :  { %v705_v19 = vpop.f32.mrb[8].mxu1  ;;  %v778_v20 = vpop.f32.mrb[16].mxu0 }
 0x1fc   :  { %v3014_v22 = vadd.f32 %v705_v19, %v541_v6  ;;  %v3016_v23 = vadd.f32 %v778_v20, %v549_v7  ;;  %v707_v35 = vpop.f32.mrb[9].mxu1  ;;  %v780_v36 = vpop.f32.mrb[17].mxu0 }
 0x1fd   :  { %v3018_v31 = vadd.f32 %v707_v35, %v545_v8  ;;  %v3020_v41 = vadd.f32 %v780_v36, %v553_v11  ;;  %v709_v62 = vpop.f32.mrb[10].mxu1  ;;  %v782_v18 = vpop.f32.mrb[18].mxu0 }
 0x1fe   :  { %3388 = vst [vmem:[#allocation18_spill] sm:$0xff] %v3014_v22  ;;  %3389 = vst [vmem:[#allocation19_spill] sm:$0xff] %v3016_v23  ;;  %v3022_v0 = vadd.f32 %v709_v62, %v541_v6  ;;  %v3024_v1 = vadd.f32 %v782_v18, %v549_v7  ;;  %v711_v2 = vpop.f32.mrb[11].mxu1  ;;  %v784_v13 = vpop.f32.mrb[19].mxu0 }
 0x1ff   :  { %3390 = vst [vmem:[#allocation20_spill] sm:$0xff] %v3018_v31  ;;  %3391 = vst [vmem:[#allocation21_spill] sm:$0xff] %v3020_v41  ;;  %v3026_v12 = vadd.f32 %v711_v2, %v545_v8  ;;  %v3028_v19 = vadd.f32 %v784_v13, %v553_v11 }
 0x200   :  { %3392 = vst [vmem:[#allocation22_spill] sm:$0xff] %v3022_v0  ;;  %3393 = vst [vmem:[#allocation23_spill] sm:$0xff] %v3024_v1 }
 0x201   :  { %3394 = vst [vmem:[#allocation24_spill] sm:$0xff] %v3026_v12  ;;  %3395 = vst [vmem:[#allocation25_spill] sm:$0xff] %v3028_v19 }
 0x203   :  { %v715_v20 = vpop.f32.mrb[12].mxu1  ;;  %v788_v23 = vpop.f32.mrb[20].mxu0 }
 0x204   :  { %v3030_v22 = vadd.f32 %v715_v20, %v541_v6  ;;  %v3032_v35 = vadd.f32 %v788_v23, %v549_v7  ;;  %v717_v36 = vpop.f32.mrb[13].mxu1  ;;  %v790_v41 = vpop.f32.mrb[21].mxu0  ;;  %v686_v23 = vadd.f32 %v2986_v4, %v541_v6 }
 0x205   :  { %v3034_v31 = vadd.f32 %v717_v36, %v545_v8  ;;  %v3036_v62 = vadd.f32 %v790_v41, %v553_v11  ;;  %v719_v18 = vpop.f32.mrb[14].mxu1  ;;  %v792_v1 = vpop.f32.mrb[22].mxu0  ;;  %v688_v36 = vadd.f32 %v687_v9, %v545_v8 }
 0x206   :  { %3396 = vst [vmem:[#allocation26_spill] sm:$0xff] %v3030_v22  ;;  %3397 = vst [vmem:[#allocation27_spill] sm:$0xff] %v3032_v35  ;;  %v3038_v0 = vadd.f32 %v719_v18, %v541_v6  ;;  %v3040_v2 = vadd.f32 %v792_v1, %v549_v7  ;;  %v721_v13 = vpop.f32.mrb[15].mxu1  ;;  %v794_v19 = vpop.f32.mrb[23].mxu0  ;;  %v759_v35 = vadd.f32 %v2988_v5, %v549_v7 }
 0x207   :  { %3398 = vst [vmem:[#allocation28_spill] sm:$0xff] %v3034_v31  ;;  %3399 = vst [vmem:[#allocation29_spill] sm:$0xff] %v3036_v62  ;;  %v3042_v12 = vadd.f32 %v721_v13, %v545_v8  ;;  %v3044_v20 = vadd.f32 %v794_v19, %v553_v11  ;;  %v761_v31 = vadd.f32 %v760_v10, %v553_v11 }
 0x208   :  { %3400 = vst [vmem:[#allocation30_spill] sm:$0xff] %v3038_v0  ;;  %3401 = vst [vmem:[#allocation31_spill] sm:$0xff] %v3040_v2 }
 0x209   :  { %3402 = vst [vmem:[#allocation32_spill] sm:$0xff] %v3042_v12  ;;  %3403 = vst [vmem:[#allocation33_spill] sm:$0xff] %v3044_v20 }
 0x20b   :  { %v1059_v41 = vpop.f32.mrb[16].mxu1  ;;  %v1100_v62 = vpop.f32.mrb[24].mxu0 }
 0x20c   :  { %v1107_v22 = vadd.f32 %v1059_v41, %v686_v23  ;;  %v1109_v63 = vadd.f32 %v1100_v62, %v759_v35  ;;  %v1061_v18 = vpop.f32.mrb[17].mxu1  ;;  %v1102_v0 = vpop.f32.mrb[25].mxu0 }
 0x20d   :  { %v1108_v1 = vadd.f32 %v1061_v18, %v688_v36  ;;  %v1110_v2 = vadd.f32 %v1102_v0, %v761_v31  ;;  %v1063_v40 = vpop.f32.mrb[18].mxu1  ;;  %v1104_v38 = vpop.f32.mrb[26].mxu0 }
 0x20e   :  { %v2160_v13 = vmul.f32 -1.442695, %v1107_v22  ;;  %v1064_v12 = vpop.f32.mrb[19].mxu1  ;;  %v1105_v19 = vpop.f32.mrb[27].mxu0 }
 0x20f   :  { %v2161_v20 = vmul.f32 -1.442695, %v1108_v1  ;;  %v2162_v4 = vmul.f32 -1.442695, %v1110_v2 }
 0x210   :  { %2351 = vpow2.f32 %v2160_v13 }
 0x211   :  { %2353 = vpow2.f32 %v2161_v20 }
 0x212   :  { %2355 = vpow2.f32 %v2162_v4 }
 0x213   :  { %2357 = vtanh.f32 %v1109_v63  ;;  %v3404_v63 = vmov 0  }
 0x21a   :  { %v2352_v5 = vpop.eup %2351 }
 0x21b   :  { %v2354_v6 = vpop.eup %2353  ;;  %v1117_v7 = vadd.f32 1.0, %v2352_v5 }
 0x21c   :  { %v1118_v9 = vadd.f32 1.0, %v2354_v6  ;;  %v2356_v10 = vpop.eup %2355 }
 0x21d   :  { %2359 = vrcp.f32 %v1117_v7  ;;  %v2358_v8 = vpop.eup %2357  ;;  %v1127_v40 = vadd.f32 1.0, %v2356_v10 }
 0x21e   :  { %2361 = vrcp.f32 %v1118_v9 }
 0x21f   :  { %2363 = vrcp.f32 %v1127_v40 }
 0x227   :  { %v2360_v31 = vpop.eup %2359 }
 0x228   :  { %v2362_v11 = vpop.eup %2361  ;;  %v1131_v38 = vmul.f32 %v2360_v31, %v2358_v8 }
 0x229   :  { %v1130_v0 = vmul.f32 0.0, %v2362_v11  ;;  %v2364_v22 = vpop.eup %2363 }
 0x22b   :  { %v3048_v12 = vadd.f32 %v1131_v38, %v1130_v0 }
 0x22d   :  { %2365 = vtanh.f32 %v3048_v12 }
 0x237   :  { %v2366_v35 = vpop.eup %2365 }
 0x238   :  { %v1134_v62 = vmul.f32 %v2366_v35, %v2364_v22 }
 0x23a   :  { %v1139_v2 = vpack.c.bf16 %v1134_v62, %v1134_v62 }
 0x23c   :  { %1173 = vmatmul.mubr.bf16.vlgmr.msra.gmra.mrb[20].mxu1 %v1139_v2  ;;  %1214 = vmatmul.mubr.bf16.vlgmr.msra.gmra.mrb[28].mxu0 %v1139_v2 }
 0x23d   :  { %1256 = vmatpush1.bf16.msra.mxu1 %v2835_v24  ;;  %1297 = vmatpush1.bf16.msra.mxu0 %v2837_v25 }
 0x23e   :  { %1257 = vmatprep.subr.bf16.mxu1 %v2839_v27  ;;  %1298 = vmatprep.subr.bf16.mxu0 %v2841_v28 }
 0x23f   :  { %1287 = vmatprep.mubr.bf16.mxu1 %v3404_v63  ;;  %1328 = vmatprep.mubr.bf16.mxu0 %v3404_v63 }
 0x241   :  { %1258 = vmatpush1.bf16.msra.mxu1 %v2847_v29  ;;  %1299 = vmatpush1.bf16.msra.mxu0 %v2849_v30 }
 0x242   :  { %1259 = vmatprep.subr.bf16.mxu1 %v2853_v33  ;;  %1300 = vmatprep.subr.bf16.mxu0 %v2855_v34 }
 0x245   :  { %1260 = vmatpush1.bf16.msra.mxu1 %v2861_v37  ;;  %1301 = vmatpush1.bf16.msra.mxu0 %v2863_v39 }
 0x246   :  { %1261 = vmatprep.subr.bf16.mxu1 %v2867_v42  ;;  %1302 = vmatprep.subr.bf16.mxu0 %v2869_v43 }
 0x249   :  { %1262 = vmatpush1.bf16.msra.mxu1 %v2875_v44  ;;  %1303 = vmatpush1.bf16.msra.mxu0 %v2877_v45 }
 0x24a   :  { %1263 = vmatprep.subr.bf16.mxu1 %v2881_v46  ;;  %1304 = vmatprep.subr.bf16.mxu0 %v2883_v47 }
 0x24d   :  { %1264 = vmatpush1.bf16.msra.mxu1 %v2889_v48  ;;  %1305 = vmatpush1.bf16.msra.mxu0 %v2891_v49 }
 0x24e   :  { %1265 = vmatprep.subr.bf16.mxu1 %v2895_v50  ;;  %1306 = vmatprep.subr.bf16.mxu0 %v2897_v51 }
 0x251   :  { %1266 = vmatpush1.bf16.msra.mxu1 %v2903_v52  ;;  %1307 = vmatpush1.bf16.msra.mxu0 %v2905_v53 }
 0x252   :  { %1267 = vmatprep.subr.bf16.mxu1 %v2909_v54  ;;  %1308 = vmatprep.subr.bf16.mxu0 %v2911_v55 }
 0x255   :  { %1268 = vmatpush1.bf16.msra.mxu1 %v2917_v56  ;;  %1309 = vmatpush1.bf16.msra.mxu0 %v2919_v57 }
 0x256   :  { %1269 = vmatprep.subr.bf16.mxu1 %v2923_v58  ;;  %1310 = vmatprep.subr.bf16.mxu0 %v2925_v59 }
 0x259   :  { %1270 = vmatpush1.bf16.msra.mxu1 %v2931_v60  ;;  %1311 = vmatpush1.bf16.msra.mxu0 %v2933_v61 }
 0x25a   :  { %1370 = vmatprep.subr.bf16.mxu1 %v2827_v16  ;;  %1411 = vmatprep.subr.bf16.mxu0 %v2829_v17 }
 0x30f   :  { %v1174_v20 = vpop.f32.mrb[20].mxu1  ;;  %v1215_v23 = vpop.f32.mrb[28].mxu0 }
 0x310   :  { %v1222_v36 = vadd.f32 %v1174_v20, %v2990_v14  ;;  %v1224_v41 = vadd.f32 %v1215_v23, %v2992_v15  ;;  %v1176_v18 = vpop.f32.mrb[21].mxu1  ;;  %v1217_v1 = vpop.f32.mrb[29].mxu0 }
 0x311   :  { %v1223_v13 = vadd.f32 %v1176_v18, %v2994_v21  ;;  %v1225_v19 = vadd.f32 %v1217_v1, %v2996_v3  ;;  %v1178_v4 = vpop.f32.mrb[22].mxu1  ;;  %v1219_v5 = vpop.f32.mrb[30].mxu0 }
 0x312   :  { %v2163_v6 = vmul.f32 -1.442695, %v1222_v36  ;;  %v1179_v7 = vpop.f32.mrb[23].mxu1  ;;  %v1220_v9 = vpop.f32.mrb[31].mxu0  ;;  %v3405_v4 = vld [vmem:[#allocation12_spill] sm:$0xff] }
 0x313   :  { %v2164_v10 = vmul.f32 -1.442695, %v1223_v13  ;;  %v2165_v8 = vmul.f32 -1.442695, %v1225_v19 }
 0x314   :  { %2367 = vpow2.f32 %v2163_v6  ;;  %v3406_v6 = vld [vmem:[#allocation13_spill] sm:$0xff] }
 0x315   :  { %2369 = vpow2.f32 %v2164_v10 }
 0x316   :  { %2371 = vpow2.f32 %v2165_v8 }
 0x317   :  { %2373 = vtanh.f32 %v1224_v41 }
 0x31e   :  { %v2368_v31 = vpop.eup %2367 }
 0x31f   :  { %v2370_v11 = vpop.eup %2369  ;;  %v1232_v14 = vadd.f32 1.0, %v2368_v31 }
 0x320   :  { %v1233_v15 = vadd.f32 1.0, %v2370_v11  ;;  %v2372_v21 = vpop.eup %2371 }
 0x321   :  { %2375 = vrcp.f32 %v1232_v14  ;;  %v2374_v38 = vpop.eup %2373  ;;  %v1242_v22 = vadd.f32 1.0, %v2372_v21 }
 0x322   :  { %2377 = vrcp.f32 %v1233_v15 }
 0x323   :  { %2379 = vrcp.f32 %v1242_v22 }
 0x32b   :  { %v2376_v3 = vpop.eup %2375 }
 0x32c   :  { %v2378_v40 = vpop.eup %2377  ;;  %v1246_v0 = vmul.f32 %v2376_v3, %v2374_v38 }
 0x32d   :  { %v1245_v35 = vmul.f32 %v2378_v40, %v3048_v12  ;;  %v2380_v2 = vpop.eup %2379 }
 0x32f   :  { %v3090_v62 = vadd.f32 %v1246_v0, %v1245_v35 }
 0x331   :  { %2381 = vtanh.f32 %v3090_v62 }
 0x33b   :  { %v2382_v20 = vpop.eup %2381 }
 0x33c   :  { %v1249_v23 = vmul.f32 %v2382_v20, %v2380_v2 }
 0x33e   :  { %v1254_v36 = vpack.c.bf16 %v1249_v23, %v1249_v23 }
 0x340   :  { %1288 = vmatmul.mubr.bf16.vlgmr.msra.gmra.mrb[24].mxu1 %v1254_v36  ;;  %1329 = vmatmul.mubr.bf16.vlgmr.msra.gmra.mrb[32].mxu0 %v1254_v36 }
 0x341   :  { %1371 = vmatpush1.bf16.msra.mxu1 %v2835_v24  ;;  %1412 = vmatpush1.bf16.msra.mxu0 %v2837_v25 }
 0x342   :  { %1372 = vmatprep.subr.bf16.mxu1 %v2839_v27  ;;  %1413 = vmatprep.subr.bf16.mxu0 %v2841_v28 }
 0x343   :  { %1402 = vmatprep.mubr.bf16.mxu1 %v3404_v63  ;;  %1443 = vmatprep.mubr.bf16.mxu0 %v3404_v63 }
 0x345   :  { %1373 = vmatpush1.bf16.msra.mxu1 %v2847_v29  ;;  %1414 = vmatpush1.bf16.msra.mxu0 %v2849_v30 }
 0x346   :  { %1374 = vmatprep.subr.bf16.mxu1 %v2853_v33  ;;  %1415 = vmatprep.subr.bf16.mxu0 %v2855_v34 }
 0x349   :  { %1375 = vmatpush1.bf16.msra.mxu1 %v2861_v37  ;;  %1416 = vmatpush1.bf16.msra.mxu0 %v2863_v39 }
 0x34a   :  { %1376 = vmatprep.subr.bf16.mxu1 %v2867_v42  ;;  %1417 = vmatprep.subr.bf16.mxu0 %v2869_v43 }
 0x34d   :  { %1377 = vmatpush1.bf16.msra.mxu1 %v2875_v44  ;;  %1418 = vmatpush1.bf16.msra.mxu0 %v2877_v45 }
 0x34e   :  { %1378 = vmatprep.subr.bf16.mxu1 %v2881_v46  ;;  %1419 = vmatprep.subr.bf16.mxu0 %v2883_v47 }
 0x351   :  { %1379 = vmatpush1.bf16.msra.mxu1 %v2889_v48  ;;  %1420 = vmatpush1.bf16.msra.mxu0 %v2891_v49 }
 0x352   :  { %1380 = vmatprep.subr.bf16.mxu1 %v2895_v50  ;;  %1421 = vmatprep.subr.bf16.mxu0 %v2897_v51 }
 0x355   :  { %1381 = vmatpush1.bf16.msra.mxu1 %v2903_v52  ;;  %1422 = vmatpush1.bf16.msra.mxu0 %v2905_v53 }
 0x356   :  { %1382 = vmatprep.subr.bf16.mxu1 %v2909_v54  ;;  %1423 = vmatprep.subr.bf16.mxu0 %v2911_v55 }
 0x359   :  { %1383 = vmatpush1.bf16.msra.mxu1 %v2917_v56  ;;  %1424 = vmatpush1.bf16.msra.mxu0 %v2919_v57 }
 0x35a   :  { %1384 = vmatprep.subr.bf16.mxu1 %v2923_v58  ;;  %1425 = vmatprep.subr.bf16.mxu0 %v2925_v59 }
 0x35d   :  { %1385 = vmatpush1.bf16.msra.mxu1 %v2931_v60  ;;  %1426 = vmatpush1.bf16.msra.mxu0 %v2933_v61 }
 0x35e   :  { %1485 = vmatprep.subr.bf16.mxu1 %v2827_v16  ;;  %1526 = vmatprep.subr.bf16.mxu0 %v2829_v17 }
 0x413   :  { %v1289_v12 = vpop.f32.mrb[24].mxu1  ;;  %v1330_v41 = vpop.f32.mrb[32].mxu0 }
 0x414   :  { %v1337_v18 = vadd.f32 %v1289_v12, %v2998_v26  ;;  %v1339_v1 = vadd.f32 %v1330_v41, %v3000_v32  ;;  %v1291_v13 = vpop.f32.mrb[25].mxu1  ;;  %v1332_v19 = vpop.f32.mrb[33].mxu0 }
 0x415   :  { %v1338_v5 = vadd.f32 %v1291_v13, %v3405_v4  ;;  %v1340_v7 = vadd.f32 %v1332_v19, %v3406_v6  ;;  %v1293_v9 = vpop.f32.mrb[26].mxu1  ;;  %v1334_v10 = vpop.f32.mrb[34].mxu0  ;;  %v3407_v13 = vld [vmem:[#allocation14_spill] sm:$0xff]  ;;  %v3408_v4 = vld [vmem:[#allocation15_spill] sm:$0xff] }
 0x416   :  { %v2166_v8 = vmul.f32 -1.442695, %v1337_v18  ;;  %v1294_v31 = vpop.f32.mrb[27].mxu1  ;;  %v1335_v11 = vpop.f32.mrb[35].mxu0  ;;  %v3409_v9 = vld [vmem:[#allocation16_spill] sm:$0xff] }
 0x417   :  { %v2167_v14 = vmul.f32 -1.442695, %v1338_v5  ;;  %v2168_v15 = vmul.f32 -1.442695, %v1340_v7 }
 0x418   :  { %2383 = vpow2.f32 %v2166_v8  ;;  %v3410_v8 = vld [vmem:[#allocation17_spill] sm:$0xff] }
 0x419   :  { %2385 = vpow2.f32 %v2167_v14 }
 0x41a   :  { %2387 = vpow2.f32 %v2168_v15 }
 0x41b   :  { %2389 = vtanh.f32 %v1339_v1 }
 0x422   :  { %v2384_v21 = vpop.eup %2383 }
 0x423   :  { %v2386_v38 = vpop.eup %2385  ;;  %v1347_v26 = vadd.f32 1.0, %v2384_v21 }
 0x424   :  { %v1348_v32 = vadd.f32 1.0, %v2386_v38  ;;  %v2388_v3 = vpop.eup %2387 }
 0x425   :  { %2391 = vrcp.f32 %v1347_v26  ;;  %v2390_v40 = vpop.eup %2389  ;;  %v1357_v2 = vadd.f32 1.0, %v2388_v3 }
 0x426   :  { %2393 = vrcp.f32 %v1348_v32 }
 0x427   :  { %2395 = vrcp.f32 %v1357_v2 }
 0x42f   :  { %v2392_v0 = vpop.eup %2391 }
 0x430   :  { %v2394_v22 = vpop.eup %2393  ;;  %v1361_v35 = vmul.f32 %v2392_v0, %v2390_v40 }
 0x431   :  { %v1360_v20 = vmul.f32 %v2394_v22, %v3090_v62  ;;  %v2396_v36 = vpop.eup %2395 }
 0x433   :  { %v3132_v23 = vadd.f32 %v1361_v35, %v1360_v20 }
 0x435   :  { %2397 = vtanh.f32 %v3132_v23 }
 0x43f   :  { %v2398_v12 = vpop.eup %2397 }
 0x440   :  { %v1364_v41 = vmul.f32 %v2398_v12, %v2396_v36 }
 0x442   :  { %v1369_v18 = vpack.c.bf16 %v1364_v41, %v1364_v41 }
 0x444   :  { %1403 = vmatmul.mubr.bf16.vlgmr.msra.gmra.mrb[28].mxu1 %v1369_v18  ;;  %1444 = vmatmul.mubr.bf16.vlgmr.msra.gmra.mrb[36].mxu0 %v1369_v18 }
 0x445   :  { %1486 = vmatpush1.bf16.msra.mxu1 %v2835_v24  ;;  %1527 = vmatpush1.bf16.msra.mxu0 %v2837_v25 }
 0x446   :  { %1487 = vmatprep.subr.bf16.mxu1 %v2839_v27  ;;  %1528 = vmatprep.subr.bf16.mxu0 %v2841_v28 }
 0x447   :  { %1517 = vmatprep.mubr.bf16.mxu1 %v3404_v63  ;;  %1558 = vmatprep.mubr.bf16.mxu0 %v3404_v63 }
 0x449   :  { %1488 = vmatpush1.bf16.msra.mxu1 %v2847_v29  ;;  %1529 = vmatpush1.bf16.msra.mxu0 %v2849_v30 }
 0x44a   :  { %1489 = vmatprep.subr.bf16.mxu1 %v2853_v33  ;;  %1530 = vmatprep.subr.bf16.mxu0 %v2855_v34 }
 0x44d   :  { %1490 = vmatpush1.bf16.msra.mxu1 %v2861_v37  ;;  %1531 = vmatpush1.bf16.msra.mxu0 %v2863_v39 }
 0x44e   :  { %1491 = vmatprep.subr.bf16.mxu1 %v2867_v42  ;;  %1532 = vmatprep.subr.bf16.mxu0 %v2869_v43 }
 0x451   :  { %1492 = vmatpush1.bf16.msra.mxu1 %v2875_v44  ;;  %1533 = vmatpush1.bf16.msra.mxu0 %v2877_v45 }
 0x452   :  { %1493 = vmatprep.subr.bf16.mxu1 %v2881_v46  ;;  %1534 = vmatprep.subr.bf16.mxu0 %v2883_v47 }
 0x455   :  { %1494 = vmatpush1.bf16.msra.mxu1 %v2889_v48  ;;  %1535 = vmatpush1.bf16.msra.mxu0 %v2891_v49 }
 0x456   :  { %1495 = vmatprep.subr.bf16.mxu1 %v2895_v50  ;;  %1536 = vmatprep.subr.bf16.mxu0 %v2897_v51 }
 0x459   :  { %1496 = vmatpush1.bf16.msra.mxu1 %v2903_v52  ;;  %1537 = vmatpush1.bf16.msra.mxu0 %v2905_v53 }
 0x45a   :  { %1497 = vmatprep.subr.bf16.mxu1 %v2909_v54  ;;  %1538 = vmatprep.subr.bf16.mxu0 %v2911_v55 }
 0x45d   :  { %1498 = vmatpush1.bf16.msra.mxu1 %v2917_v56  ;;  %1539 = vmatpush1.bf16.msra.mxu0 %v2919_v57 }
 0x45e   :  { %1499 = vmatprep.subr.bf16.mxu1 %v2923_v58  ;;  %1540 = vmatprep.subr.bf16.mxu0 %v2925_v59 }
 0x461   :  { %1500 = vmatpush1.bf16.msra.mxu1 %v2931_v60  ;;  %1541 = vmatpush1.bf16.msra.mxu0 %v2933_v61 }
 0x462   :  { %1600 = vmatprep.subr.bf16.mxu1 %v2827_v16  ;;  %1641 = vmatprep.subr.bf16.mxu0 %v2829_v17 }
 0x517   :  { %v1404_v62 = vpop.f32.mrb[28].mxu1  ;;  %v1445_v1 = vpop.f32.mrb[36].mxu0 }
 0x518   :  { %v1452_v19 = vadd.f32 %v1404_v62, %v3407_v13  ;;  %v1454_v5 = vadd.f32 %v1445_v1, %v3408_v4  ;;  %v1406_v6 = vpop.f32.mrb[29].mxu1  ;;  %v1447_v7 = vpop.f32.mrb[37].mxu0 }
 0x519   :  { %v1453_v10 = vadd.f32 %v1406_v6, %v3409_v9  ;;  %v1455_v31 = vadd.f32 %v1447_v7, %v3410_v8  ;;  %v1408_v11 = vpop.f32.mrb[30].mxu1  ;;  %v1449_v14 = vpop.f32.mrb[38].mxu0 }
 0x51a   :  { %v2169_v15 = vmul.f32 -1.442695, %v1452_v19  ;;  %v1409_v21 = vpop.f32.mrb[31].mxu1  ;;  %v1450_v38 = vpop.f32.mrb[39].mxu0 }
 0x51b   :  { %v2170_v26 = vmul.f32 -1.442695, %v1453_v10  ;;  %v2171_v32 = vmul.f32 -1.442695, %v1455_v31 }
 0x51c   :  { %2399 = vpow2.f32 %v2169_v15 }
 0x51d   :  { %2401 = vpow2.f32 %v2170_v26 }
 0x51e   :  { %2403 = vpow2.f32 %v2171_v32 }
 0x51f   :  { %2405 = vtanh.f32 %v1454_v5 }
 0x526   :  { %v2400_v3 = vpop.eup %2399 }
 0x527   :  { %v2402_v40 = vpop.eup %2401  ;;  %v1462_v0 = vadd.f32 1.0, %v2400_v3 }
 0x528   :  { %v1463_v22 = vadd.f32 1.0, %v2402_v40  ;;  %v2404_v35 = vpop.eup %2403 }
 0x529   :  { %2407 = vrcp.f32 %v1462_v0  ;;  %v2406_v2 = vpop.eup %2405  ;;  %v1472_v41 = vadd.f32 1.0, %v2404_v35  ;;  %v3219_v0 = vld [vmem:[#allocation7] ss:$16 sps:$4 sm:$0xff]   ;;  %v3225_v35 = vld [vmem:[#allocation7 + $0x24] ss:$16 sps:$4 sm:$0xff]  }
 0x52a   :  { %2409 = vrcp.f32 %v1463_v22  ;;  %v3222_v22 = vld [vmem:[#allocation7 + $0x8] ss:$16 sps:$4 sm:$0xff]  }
 0x52b   :  { %2411 = vrcp.f32 %v1472_v41  ;;  %v3242_v41 = vld [vmem:[#allocation7 + $0x4c] ss:$16 sps:$4 sm:$0xff]  }
 0x533   :  { %v2408_v20 = vpop.eup %2407 }
 0x534   :  { %v2410_v36 = vpop.eup %2409  ;;  %v1476_v12 = vmul.f32 %v2408_v20, %v2406_v2  ;;  %v3228_v2 = vld [vmem:[#allocation7 + $0x2c] ss:$16 sps:$4 sm:$0xff]   ;;  %v3233_v20 = vld [vmem:[#allocation7 + $0x20] ss:$16 sps:$4 sm:$0xff]  }
 0x535   :  { %v1475_v18 = vmul.f32 %v2410_v36, %v3132_v23  ;;  %v2412_v1 = vpop.eup %2411  ;;  %v3236_v36 = vld [vmem:[#allocation7 + $0x28] ss:$16 sps:$4 sm:$0xff]  }
 0x537   :  { %v3174_v62 = vadd.f32 %v1476_v12, %v1475_v18  ;;  %v3239_v12 = vld [vmem:[#allocation7 + $0x44] ss:$16 sps:$4 sm:$0xff]   ;;  %v3245_v18 = vld [vmem:[#allocation7 + $0x40] ss:$16 sps:$4 sm:$0xff]  }
 0x539   :  { %2413 = vtanh.f32 %v3174_v62 }
 0x543   :  { %v2414_v13 = vpop.eup %2413 }
 0x544   :  { %v1479_v19 = vmul.f32 %v2414_v13, %v2412_v1  ;;  %v3251_v1 = vld [vmem:[#allocation7 + $0x64] ss:$16 sps:$4 sm:$0xff]   ;;  %v3254_v13 = vld [vmem:[#allocation7 + $0x6c] ss:$16 sps:$4 sm:$0xff]  }
 0x546   :  { %v1484_v4 = vpack.c.bf16 %v1479_v19, %v1479_v19  ;;  %v3257_v19 = vld [vmem:[#allocation7 + $0x60] ss:$16 sps:$4 sm:$0xff]  }
 0x548   :  { %1518 = vmatmul.mubr.bf16.vlgmr.msra.gmra.mrb[32].mxu1 %v1484_v4  ;;  %1559 = vmatmul.mubr.bf16.vlgmr.msra.gmra.mrb[40].mxu0 %v1484_v4  ;;  %v3260_v4 = vld [vmem:[#allocation7 + $0x68] ss:$16 sps:$4 sm:$0xff]  }
 0x549   :  { %1601 = vmatpush1.bf16.msra.mxu1 %v2835_v24  ;;  %1642 = vmatpush1.bf16.msra.mxu0 %v2837_v25 }
 0x54a   :  { %1602 = vmatprep.subr.bf16.mxu1 %v2839_v27  ;;  %1643 = vmatprep.subr.bf16.mxu0 %v2841_v28  ;;  %v3411_v27 = vld [vmem:[#allocation18_spill] sm:$0xff] }
 0x54b   :  { %1632 = vmatprep.mubr.bf16.mxu1 %v3404_v63  ;;  %1673 = vmatprep.mubr.bf16.mxu0 %v3404_v63 }
 0x54d   :  { %1603 = vmatpush1.bf16.msra.mxu1 %v2847_v29  ;;  %1644 = vmatpush1.bf16.msra.mxu0 %v2849_v30  ;;  %v3412_v29 = vld [vmem:[#allocation19_spill] sm:$0xff] }
 0x54e   :  { %1604 = vmatprep.subr.bf16.mxu1 %v2853_v33  ;;  %1645 = vmatprep.subr.bf16.mxu0 %v2855_v34 }
 0x551   :  { %1605 = vmatpush1.bf16.msra.mxu1 %v2861_v37  ;;  %1646 = vmatpush1.bf16.msra.mxu0 %v2863_v39  ;;  %v3413_v37 = vld [vmem:[#allocation20_spill] sm:$0xff] }
 0x552   :  { %1606 = vmatprep.subr.bf16.mxu1 %v2867_v42  ;;  %1647 = vmatprep.subr.bf16.mxu0 %v2869_v43  ;;  %v3414_v42 = vld [vmem:[#allocation21_spill] sm:$0xff] }
 0x555   :  { %1607 = vmatpush1.bf16.msra.mxu1 %v2875_v44  ;;  %1648 = vmatpush1.bf16.msra.mxu0 %v2877_v45 }
 0x556   :  { %1608 = vmatprep.subr.bf16.mxu1 %v2881_v46  ;;  %1649 = vmatprep.subr.bf16.mxu0 %v2883_v47 }
 0x559   :  { %1609 = vmatpush1.bf16.msra.mxu1 %v2889_v48  ;;  %1650 = vmatpush1.bf16.msra.mxu0 %v2891_v49 }
 0x55a   :  { %1610 = vmatprep.subr.bf16.mxu1 %v2895_v50  ;;  %1651 = vmatprep.subr.bf16.mxu0 %v2897_v51 }
 0x55d   :  { %1611 = vmatpush1.bf16.msra.mxu1 %v2903_v52  ;;  %1652 = vmatpush1.bf16.msra.mxu0 %v2905_v53 }
 0x55e   :  { %1612 = vmatprep.subr.bf16.mxu1 %v2909_v54  ;;  %1653 = vmatprep.subr.bf16.mxu0 %v2911_v55 }
 0x561   :  { %1613 = vmatpush1.bf16.msra.mxu1 %v2917_v56  ;;  %1654 = vmatpush1.bf16.msra.mxu0 %v2919_v57 }
 0x562   :  { %1614 = vmatprep.subr.bf16.mxu1 %v2923_v58  ;;  %1655 = vmatprep.subr.bf16.mxu0 %v2925_v59 }
 0x565   :  { %1615 = vmatpush1.bf16.msra.mxu1 %v2931_v60  ;;  %1656 = vmatpush1.bf16.msra.mxu0 %v2933_v61 }
 0x566   :  { %1715 = vmatprep.subr.bf16.mxu1 %v2827_v16  ;;  %1756 = vmatprep.subr.bf16.mxu0 %v2829_v17 }
 0x61b   :  { %v1519_v24 = vpop.f32.mrb[32].mxu1  ;;  %v1560_v25 = vpop.f32.mrb[40].mxu0 }
 0x61c   :  { %v1567_v28 = vadd.f32 %v1519_v24, %v3411_v27  ;;  %v1569_v30 = vadd.f32 %v1560_v25, %v3412_v29  ;;  %v1521_v33 = vpop.f32.mrb[33].mxu1  ;;  %v1562_v34 = vpop.f32.mrb[41].mxu0  ;;  %v3263_v24 = vld [vmem:[#allocation7 + $0x84] ss:$16 sps:$4 sm:$0xff]   ;;  %v3266_v25 = vld [vmem:[#allocation7 + $0x8c] ss:$16 sps:$4 sm:$0xff]  }
 0x61d   :  { %v1568_v39 = vadd.f32 %v1521_v33, %v3413_v37  ;;  %v1570_v43 = vadd.f32 %v1562_v34, %v3414_v42  ;;  %v1523_v44 = vpop.f32.mrb[34].mxu1  ;;  %v1564_v45 = vpop.f32.mrb[42].mxu0  ;;  %v3417_v27 = vld [vmem:[#allocation24_spill] sm:$0xff] }
 0x61e   :  { %v2172_v46 = vmul.f32 -1.442695, %v1567_v28  ;;  %v1524_v47 = vpop.f32.mrb[35].mxu1  ;;  %v1565_v23 = vpop.f32.mrb[43].mxu0  ;;  %v3418_v28 = vld [vmem:[#allocation25_spill] sm:$0xff] }
 0x61f   :  { %v2173_v16 = vmul.f32 -1.442695, %v1568_v39  ;;  %v2174_v17 = vmul.f32 -1.442695, %v1570_v43 }
 0x620   :  { %2415 = vpow2.f32 %v2172_v46 }
 0x621   :  { %2417 = vpow2.f32 %v2173_v16 }
 0x622   :  { %2419 = vpow2.f32 %v2174_v17 }
 0x623   :  { %2421 = vtanh.f32 %v1569_v30 }
 0x62a   :  { %v2416_v5 = vpop.eup %2415 }
 0x62b   :  { %v2418_v6 = vpop.eup %2417  ;;  %v1577_v7 = vadd.f32 1.0, %v2416_v5 }
 0x62c   :  { %v1578_v9 = vadd.f32 1.0, %v2418_v6  ;;  %v2420_v10 = vpop.eup %2419 }
 0x62d   :  { %2423 = vrcp.f32 %v1577_v7  ;;  %v2422_v8 = vpop.eup %2421  ;;  %v1587_v15 = vadd.f32 1.0, %v2420_v10 }
 0x62e   :  { %2425 = vrcp.f32 %v1578_v9 }
 0x62f   :  { %2427 = vrcp.f32 %v1587_v15  ;;  %v2501_v15 = vld [vmem:[#allocation7 + $0xa0] ss:$16 sps:$4 sm:$0xff]  }
 0x637   :  { %v2424_v31 = vpop.eup %2423 }
 0x638   :  { %v2426_v11 = vpop.eup %2425  ;;  %v1591_v14 = vmul.f32 %v2424_v31, %v2422_v8  ;;  %v2498_v31 = vld [vmem:[#allocation7 + $0x88] ss:$16 sps:$4 sm:$0xff]  }
 0x639   :  { %v1590_v21 = vmul.f32 %v2426_v11, %v3174_v62  ;;  %v2428_v26 = vpop.eup %2427  ;;  %v3248_v62 = vld [vmem:[#allocation7 + $0x48] ss:$16 sps:$4 sm:$0xff]   ;;  %v2499_v11 = vld [vmem:[#allocation7 + $0xa4] ss:$16 sps:$4 sm:$0xff]  }
 0x63b   :  { %v3216_v38 = vadd.f32 %v1591_v14, %v1590_v21  ;;  %v2500_v14 = vld [vmem:[#allocation7 + $0xac] ss:$16 sps:$4 sm:$0xff]   ;;  %v2502_v21 = vld [vmem:[#allocation7 + $0xa8] ss:$16 sps:$4 sm:$0xff]  }
 0x63d   :  { %2429 = vtanh.f32 %v3216_v38 }
 0x647   :  { %v2430_v32 = vpop.eup %2429 }
 0x648   :  { %v1594_v3 = vmul.f32 %v2430_v32, %v2428_v26  ;;  %v2504_v26 = vld [vmem:[#allocation7 + $0xcc] ss:$16 sps:$4 sm:$0xff]   ;;  %v2505_v32 = vld [vmem:[#allocation7 + $0xc0] ss:$16 sps:$4 sm:$0xff]  }
 0x64a   :  { %v1599_v40 = vpack.c.bf16 %v1594_v3, %v1594_v3  ;;  %v2506_v3 = vld [vmem:[#allocation7 + $0xc8] ss:$16 sps:$4 sm:$0xff]  }
 0x64c   :  { %1633 = vmatmul.mubr.bf16.vlgmr.msra.gmra.mrb[36].mxu1 %v1599_v40  ;;  %1674 = vmatmul.mubr.bf16.vlgmr.msra.gmra.mrb[44].mxu0 %v1599_v40  ;;  %v2507_v40 = vld [vmem:[#allocation7 + $0xe4] ss:$16 sps:$4 sm:$0xff]  }
 0x64d   :  { %1716 = vmatpush1.bf16.msra.mxu1 %v3219_v0  ;;  %1757 = vmatpush1.bf16.msra.mxu0 %v3222_v22 }
 0x64e   :  { %1717 = vmatprep.subr.bf16.mxu1 %v3225_v35  ;;  %1758 = vmatprep.subr.bf16.mxu0 %v3228_v2 }
 0x64f   :  { %1747 = vmatprep.mubr.bf16.mxu1 %v3404_v63  ;;  %1788 = vmatprep.mubr.bf16.mxu0 %v3404_v63 }
 0x651   :  { %1718 = vmatpush1.bf16.msra.mxu1 %v3233_v20  ;;  %1759 = vmatpush1.bf16.msra.mxu0 %v3236_v36 }
 0x652   :  { %1719 = vmatprep.subr.bf16.mxu1 %v3239_v12  ;;  %1760 = vmatprep.subr.bf16.mxu0 %v3242_v41 }
 0x655   :  { %1720 = vmatpush1.bf16.msra.mxu1 %v3245_v18  ;;  %1761 = vmatpush1.bf16.msra.mxu0 %v3248_v62 }
 0x656   :  { %1721 = vmatprep.subr.bf16.mxu1 %v3251_v1  ;;  %1762 = vmatprep.subr.bf16.mxu0 %v3254_v13 }
 0x659   :  { %1722 = vmatpush1.bf16.msra.mxu1 %v3257_v19  ;;  %1763 = vmatpush1.bf16.msra.mxu0 %v3260_v4 }
 0x65a   :  { %1723 = vmatprep.subr.bf16.mxu1 %v3263_v24  ;;  %1764 = vmatprep.subr.bf16.mxu0 %v3266_v25 }
 0x65d   :  { %1724 = vmatpush1.bf16.msra.mxu1 %v2889_v48  ;;  %1765 = vmatpush1.bf16.msra.mxu0 %v2891_v49  ;;  %v2495_v48 = vld [vmem:[#allocation7 + $0x4] ss:$16 sps:$4 sm:$0xff]   ;;  %v2496_v49 = vld [vmem:[#allocation7 + $0xc] ss:$16 sps:$4 sm:$0xff]  }
 0x65e   :  { %1725 = vmatprep.subr.bf16.mxu1 %v2895_v50  ;;  %1766 = vmatprep.subr.bf16.mxu0 %v2897_v51 }
 0x661   :  { %1726 = vmatpush1.bf16.msra.mxu1 %v2903_v52  ;;  %1767 = vmatpush1.bf16.msra.mxu0 %v2905_v53  ;;  %v3415_v52 = vld [vmem:[#allocation22_spill] sm:$0xff] }
 0x662   :  { %1727 = vmatprep.subr.bf16.mxu1 %v2909_v54  ;;  %1768 = vmatprep.subr.bf16.mxu0 %v2911_v55  ;;  %v3416_v54 = vld [vmem:[#allocation23_spill] sm:$0xff] }
 0x665   :  { %1728 = vmatpush1.bf16.msra.mxu1 %v2917_v56  ;;  %1769 = vmatpush1.bf16.msra.mxu0 %v2919_v57 }
 0x666   :  { %1729 = vmatprep.subr.bf16.mxu1 %v2923_v58  ;;  %1770 = vmatprep.subr.bf16.mxu0 %v2925_v59 }
 0x669   :  { %1730 = vmatpush1.bf16.msra.mxu1 %v2931_v60  ;;  %1771 = vmatpush1.bf16.msra.mxu0 %v2933_v61 }
 0x66a   :  { %1830 = vmatprep.subr.bf16.mxu1 %v2495_v48  ;;  %1871 = vmatprep.subr.bf16.mxu0 %v2496_v49 }
 0x71f   :  { %v1634_v50 = vpop.f32.mrb[36].mxu1  ;;  %v1675_v51 = vpop.f32.mrb[44].mxu0 }
 0x720   :  { %v1682_v53 = vadd.f32 %v1634_v50, %v3415_v52  ;;  %v1684_v55 = vadd.f32 %v1675_v51, %v3416_v54  ;;  %v1636_v56 = vpop.f32.mrb[37].mxu1  ;;  %v1677_v57 = vpop.f32.mrb[45].mxu0 }
 0x721   :  { %v1683_v58 = vadd.f32 %v1636_v56, %v3417_v27  ;;  %v1685_v59 = vadd.f32 %v1677_v57, %v3418_v28  ;;  %v1638_v29 = vpop.f32.mrb[38].mxu1  ;;  %v1679_v60 = vpop.f32.mrb[46].mxu0 }
 0x722   :  { %v2175_v30 = vmul.f32 -1.442695, %v1682_v53  ;;  %v1639_v61 = vpop.f32.mrb[39].mxu1  ;;  %v1680_v33 = vpop.f32.mrb[47].mxu0 }
 0x723   :  { %v2176_v34 = vmul.f32 -1.442695, %v1683_v58  ;;  %v2177_v37 = vmul.f32 -1.442695, %v1685_v59 }
 0x724   :  { %2431 = vpow2.f32 %v2175_v30 }
 0x725   :  { %2433 = vpow2.f32 %v2176_v34 }
 0x726   :  { %2435 = vpow2.f32 %v2177_v37 }
 0x727   :  { %2437 = vtanh.f32 %v1684_v55 }
 0x72e   :  { %v2432_v39 = vpop.eup %2431 }
 0x72f   :  { %v2434_v42 = vpop.eup %2433  ;;  %v1692_v43 = vadd.f32 1.0, %v2432_v39 }
 0x730   :  { %v1693_v44 = vadd.f32 1.0, %v2434_v42  ;;  %v2436_v45 = vpop.eup %2435 }
 0x731   :  { %2439 = vrcp.f32 %v1692_v43  ;;  %v2438_v46 = vpop.eup %2437  ;;  %v1702_v17 = vadd.f32 1.0, %v2436_v45  ;;  %v2343_v43 = vld [vmem:[%s3375_s5] sm:$0xff]   ;;  %v2345_v45 = vld [vmem:[%s3375_s5 + $0x10] sm:$0xff]  }
 0x732   :  { %2441 = vrcp.f32 %v1693_v44  ;;  %v2344_v44 = vld [vmem:[%s3375_s5 + $0x8] sm:$0xff]  }
 0x733   :  { %2443 = vrcp.f32 %v1702_v17  ;;  %v2350_v17 = vld [vmem:[%s3375_s5 + $0x38] sm:$0xff]  }
 0x73b   :  { %v2440_v47 = vpop.eup %2439 }
 0x73c   :  { %v2442_v23 = vpop.eup %2441  ;;  %v1706_v16 = vmul.f32 %v2440_v47, %v2438_v46  ;;  %v2346_v46 = vld [vmem:[%s3375_s5 + $0x18] sm:$0xff]   ;;  %v2347_v47 = vld [vmem:[%s3375_s5 + $0x20] sm:$0xff]  }
 0x73d   :  { %v1705_v5 = vmul.f32 %v2442_v23, %v3216_v38  ;;  %v2444_v7 = vpop.eup %2443  ;;  %v2503_v38 = vld [vmem:[#allocation7 + $0xc4] ss:$16 sps:$4 sm:$0xff]   ;;  %v2348_v23 = vld [vmem:[%s3375_s5 + $0x28] sm:$0xff]  }
 0x73f   :  { %v3288_v6 = vadd.f32 %v1706_v16, %v1705_v5  ;;  %v2349_v16 = vld [vmem:[%s3375_s5 + $0x30] sm:$0xff]  }
 0x741   :  { %2445 = vtanh.f32 %v3288_v6 }
 0x74b   :  { %v2446_v9 = vpop.eup %2445 }
 0x74c   :  { %v1709_v10 = vmul.f32 %v2446_v9, %v2444_v7  ;;  %v3424_v7 = vld [vmem:[#allocation30_spill] sm:$0xff] }
 0x74e   :  { %v1714_v8 = vpack.c.bf16 %v1709_v10, %v1709_v10  ;;  %v3425_v10 = vld [vmem:[#allocation31_spill] sm:$0xff] }
 0x750   :  { %1748 = vmatmul.mubr.bf16.vlgmr.msra.gmra.mrb[40].mxu1 %v1714_v8  ;;  %1789 = vmatmul.mubr.bf16.vlgmr.msra.gmra.mrb[48].mxu0 %v1714_v8 }
 0x751   :  { %1831 = vmatpush1.bf16.msra.mxu1 %v3219_v0  ;;  %1872 = vmatpush1.bf16.msra.mxu0 %v3222_v22  ;;  %v2508_v0 = vld [vmem:[#allocation7 + $0xec] ss:$16 sps:$4 sm:$0xff]   ;;  %v2509_v22 = vld [vmem:[#allocation7 + $0xe0] ss:$16 sps:$4 sm:$0xff]  }
 0x752   :  { %1832 = vmatprep.subr.bf16.mxu1 %v3225_v35  ;;  %1873 = vmatprep.subr.bf16.mxu0 %v3228_v2  ;;  %v2510_v35 = vld [vmem:[#allocation7 + $0xe8] ss:$16 sps:$4 sm:$0xff]   ;;  %v3419_v2 = vmov 0.0  }
 0x753   :  { %1862 = vmatprep.mubr.bf16.mxu1 %v3404_v63  ;;  %1903 = vmatprep.mubr.bf16.mxu0 %v3404_v63  ;;  %v2497_v63 = vld [vmem:[#allocation7 + $0x80] ss:$16 sps:$4 sm:$0xff]  }
 0x755   :  { %1833 = vmatpush1.bf16.msra.mxu1 %v3233_v20  ;;  %1874 = vmatpush1.bf16.msra.mxu0 %v3236_v36 }
 0x756   :  { %1834 = vmatprep.subr.bf16.mxu1 %v3239_v12  ;;  %1875 = vmatprep.subr.bf16.mxu0 %v3242_v41  ;;  %v3420_v12 = vld [vmem:[#allocation26_spill] sm:$0xff] }
 0x759   :  { %1835 = vmatpush1.bf16.msra.mxu1 %v3245_v18  ;;  %1876 = vmatpush1.bf16.msra.mxu0 %v3248_v62  ;;  %v3421_v18 = vld [vmem:[#allocation27_spill] sm:$0xff] }
 0x75a   :  { %1836 = vmatprep.subr.bf16.mxu1 %v3251_v1  ;;  %1877 = vmatprep.subr.bf16.mxu0 %v3254_v13 }
 0x75d   :  { %1837 = vmatpush1.bf16.msra.mxu1 %v3257_v19  ;;  %1878 = vmatpush1.bf16.msra.mxu0 %v3260_v4  ;;  %v3422_v19 = vld [vmem:[#allocation28_spill] sm:$0xff] }
 0x75e   :  { %1838 = vmatprep.subr.bf16.mxu1 %v3263_v24  ;;  %1879 = vmatprep.subr.bf16.mxu0 %v3266_v25  ;;  %v3423_v24 = vld [vmem:[#allocation29_spill] sm:$0xff] }
 0x761   :  { %1839 = vmatpush1.bf16.msra.mxu1 %v2497_v63  ;;  %1880 = vmatpush1.bf16.msra.mxu0 %v2498_v31 }
 0x762   :  { %1840 = vmatprep.subr.bf16.mxu1 %v2499_v11  ;;  %1881 = vmatprep.subr.bf16.mxu0 %v2500_v14  ;;  %v3426_v11 = vld [vmem:[#allocation32_spill] sm:$0xff] }
 0x765   :  { %1841 = vmatpush1.bf16.msra.mxu1 %v2501_v15  ;;  %1882 = vmatpush1.bf16.msra.mxu0 %v2502_v21  ;;  %v3427_v15 = vld [vmem:[#allocation33_spill] sm:$0xff] }
 0x766   :  { %1842 = vmatprep.subr.bf16.mxu1 %v2503_v38  ;;  %1883 = vmatprep.subr.bf16.mxu0 %v2504_v26 }
 0x769   :  { %1843 = vmatpush1.bf16.msra.mxu1 %v2505_v32  ;;  %1884 = vmatpush1.bf16.msra.mxu0 %v2506_v3 }
 0x76a   :  { %1844 = vmatprep.subr.bf16.mxu1 %v2507_v40  ;;  %1885 = vmatprep.subr.bf16.mxu0 %v2508_v0 }
 0x76d   :  { %1845 = vmatpush1.bf16.msra.mxu1 %v2509_v22  ;;  %1886 = vmatpush1.bf16.msra.mxu0 %v2510_v35 }
 0x76e   :  { %2235 = vmatprep.subr.bf16.mxu1 %v3419_v2 }
 0x823   :  { %v1749_v20 = vpop.f32.mrb[40].mxu1  ;;  %v1790_v36 = vpop.f32.mrb[48].mxu0 }
 0x824   :  { %v1797_v41 = vadd.f32 %v1749_v20, %v3420_v12  ;;  %v1799_v62 = vadd.f32 %v1790_v36, %v3421_v18  ;;  %v1751_v1 = vpop.f32.mrb[41].mxu1  ;;  %v1792_v13 = vpop.f32.mrb[49].mxu0 }
 0x825   :  { %v1798_v4 = vadd.f32 %v1751_v1, %v3422_v19  ;;  %v1800_v25 = vadd.f32 %v1792_v13, %v3423_v24  ;;  %v1753_v48 = vpop.f32.mrb[42].mxu1  ;;  %v1794_v49 = vpop.f32.mrb[50].mxu0 }
 0x826   :  { %v2178_v50 = vmul.f32 -1.442695, %v1797_v41  ;;  %v1754_v51 = vpop.f32.mrb[43].mxu1  ;;  %v1795_v52 = vpop.f32.mrb[51].mxu0 }
 0x827   :  { %v2179_v53 = vmul.f32 -1.442695, %v1798_v4  ;;  %v2180_v54 = vmul.f32 -1.442695, %v1800_v25 }
 0x828   :  { %2447 = vpow2.f32 %v2178_v50  ;;  %v2184_v50 = vld [vmem:[%s3376_s6] ss:$0 sm:$0xff] }
 0x829   :  { %2449 = vpow2.f32 %v2179_v53 }
 0x82a   :  { %2451 = vpow2.f32 %v2180_v54 }
 0x82b   :  { %2453 = vtanh.f32 %v1799_v62 }
 0x832   :  { %v2448_v55 = vpop.eup %2447 }
 0x833   :  { %v2450_v56 = vpop.eup %2449  ;;  %v1807_v57 = vadd.f32 1.0, %v2448_v55 }
 0x834   :  { %v1808_v27 = vadd.f32 1.0, %v2450_v56  ;;  %v2452_v58 = vpop.eup %2451 }
 0x835   :  { %2455 = vrcp.f32 %v1807_v57  ;;  %v2454_v28 = vpop.eup %2453  ;;  %v1817_v30 = vadd.f32 1.0, %v2452_v58 }
 0x836   :  { %2457 = vrcp.f32 %v1808_v27 }
 0x837   :  { %2459 = vrcp.f32 %v1817_v30 }
 0x83f   :  { %v2456_v59 = vpop.eup %2455 }
 0x840   :  { %v2458_v29 = vpop.eup %2457  ;;  %v1821_v60 = vmul.f32 %v2456_v59, %v2454_v28 }
 0x841   :  { %v1820_v61 = vmul.f32 %v2458_v29, %v3288_v6  ;;  %v2460_v34 = vpop.eup %2459 }
 0x843   :  { %v3315_v33 = vadd.f32 %v1821_v60, %v1820_v61 }
 0x845   :  { %2461 = vtanh.f32 %v3315_v33 }
 0x84f   :  { %v2462_v37 = vpop.eup %2461 }
 0x850   :  { %v1824_v39 = vmul.f32 %v2462_v37, %v2460_v34 }
 0x852   :  { %v1829_v42 = vpack.c.bf16 %v1824_v39, %v1824_v39 }
 0x854   :  { %1863 = vmatmul.mubr.bf16.vlgmr.msra.gmra.mrb[44].mxu1 %v1829_v42  ;;  %1904 = vmatmul.mubr.bf16.vlgmr.msra.gmra.mrb[52].mxu0 %v1829_v42 }
 0x855   :  { %2236 = vmatpush3.bf16.msra.mxu1 %v2343_v43  ;;  %2251 = vmatprep.mubr.msk.bf16.mxu1 %vm2579_vm11, %v3419_v2 }
 0x856   :  { %2237 = vmatprep.subr.bf16.mxu1 %v3419_v2 }
 0x859   :  { %2238 = vmatpush3.bf16.msra.mxu1 %v2344_v44 }
 0x85a   :  { %2239 = vmatprep.subr.bf16.mxu1 %v3419_v2 }
 0x85d   :  { %2240 = vmatpush3.bf16.msra.mxu1 %v2345_v45 }
 0x85e   :  { %2241 = vmatprep.subr.bf16.mxu1 %v3419_v2 }
 0x861   :  { %2242 = vmatpush3.bf16.msra.mxu1 %v2346_v46 }
 0x862   :  { %2243 = vmatprep.subr.bf16.mxu1 %v3419_v2 }
 0x865   :  { %2244 = vmatpush3.bf16.msra.mxu1 %v2347_v47 }
 0x866   :  { %2245 = vmatprep.subr.bf16.mxu1 %v3419_v2 }
 0x869   :  { %2246 = vmatpush3.bf16.msra.mxu1 %v2348_v23 }
 0x86a   :  { %2247 = vmatprep.subr.bf16.mxu1 %v3419_v2 }
 0x86d   :  { %2248 = vmatpush3.bf16.msra.mxu1 %v2349_v16 }
 0x86e   :  { %2249 = vmatprep.subr.bf16.mxu1 %v3419_v2 }
 0x871   :  { %2250 = vmatpush3.bf16.msra.mxu1 %v2350_v17 }
 0x927   :  { %v1864_v5 = vpop.f32.mrb[44].mxu1  ;;  %v1905_v6 = vpop.f32.mrb[52].mxu0 }
 0x928   :  { %v1912_v9 = vadd.f32 %v1864_v5, %v3424_v7  ;;  %v1914_v8 = vadd.f32 %v1905_v6, %v3425_v10  ;;  %v1866_v63 = vpop.f32.mrb[45].mxu1  ;;  %v1907_v31 = vpop.f32.mrb[53].mxu0 }
 0x929   :  { %v1913_v14 = vadd.f32 %v1866_v63, %v3426_v11  ;;  %v1915_v21 = vadd.f32 %v1907_v31, %v3427_v15  ;;  %v1868_v38 = vpop.f32.mrb[46].mxu1  ;;  %v1909_v26 = vpop.f32.mrb[54].mxu0 }
 0x92a   :  { %v2181_v32 = vmul.f32 -1.442695, %v1912_v9  ;;  %v1869_v3 = vpop.f32.mrb[47].mxu1  ;;  %v1910_v40 = vpop.f32.mrb[55].mxu0 }
 0x92b   :  { %v2182_v0 = vmul.f32 -1.442695, %v1913_v14  ;;  %v2183_v22 = vmul.f32 -1.442695, %v1915_v21 }
 0x92c   :  { %2463 = vpow2.f32 %v2181_v32 }
 0x92d   :  { %2465 = vpow2.f32 %v2182_v0 }
 0x92e   :  { %2467 = vpow2.f32 %v2183_v22 }
 0x92f   :  { %2469 = vtanh.f32 %v1914_v8 }
 0x936   :  { %v2464_v35 = vpop.eup %2463 }
 0x937   :  { %v2466_v2 = vpop.eup %2465  ;;  %v1922_v20 = vadd.f32 1.0, %v2464_v35 }
 0x938   :  { %v1923_v36 = vadd.f32 1.0, %v2466_v2  ;;  %v2468_v12 = vpop.eup %2467 }
 0x939   :  { %2471 = vrcp.f32 %v1922_v20  ;;  %v2470_v41 = vpop.eup %2469  ;;  %v1932_v13 = vadd.f32 1.0, %v2468_v12 }
 0x93a   :  { %2473 = vrcp.f32 %v1923_v36 }
 0x93b   :  { %2475 = vrcp.f32 %v1932_v13 }
 0x943   :  { %v2472_v18 = vpop.eup %2471 }
 0x944   :  { %v2474_v62 = vpop.eup %2473  ;;  %v1936_v1 = vmul.f32 %v2472_v18, %v2470_v41 }
 0x945   :  { %v1935_v19 = vmul.f32 %v2474_v62, %v3315_v33  ;;  %v2476_v24 = vpop.eup %2475 }
 0x947   :  { %v1937_v4 = vadd.f32 %v1936_v1, %v1935_v19 }
 0x949   :  { %2477 = vtanh.f32 %v1937_v4 }
 0x953   :  { %v2478_v25 = vpop.eup %2477 }
 0x954   :  { %v1939_v48 = vmul.f32 %v2478_v25, %v2476_v24 }
 0x956   :  { %v1940_v49 = vpack.c.bf16 %v1939_v48, %v1939_v48 }
 0x958   :  { %2252 = vmatmul.mubr.bf16.vlgmr.msra.gmra.mrb[48].mxu1 %v1940_v49 }
 0xa2b   :  { %v2046_v51 = vpop.f32.mrb[48].mxu1 }
 0xa2c   :  { %v2047_v52 = vadd.f32 %v2184_v50, %v2046_v51  ;;  %v2253_v53 = vpop.f32.mrb[49].mxu1 }
 0xa2d   :  { %v2049_v54 = vpop.f32.mrb[50].mxu1 }
 0xa2e   :  { %v2254_v55 = vpop.f32.mrb[51].mxu1  ;;  %2053 = vst.msk [vmem:[#allocation8] sm:$0x3] %vm2052_vm12, %v2047_v52 }
 0xa2f   :  { %2556 = shalt.err (!%p2553_p3)
}
 0xa30   :  { %s2557_s6 = scalar_lea.hbm %s3377_s7, 32 }
 0xa31   :  { %p2558_p4 = scmp.ne.s32.totalorder %s3377_s7, %s2557_s6  ;;  %p2561_p5 = scmp.lt.u32.totalorder %s2557_s6, %s3377_s7 }
 0xa33   :  { %p2563_p6 = pnand %p2561_p5, %p2558_p4 }
 0xa35   :  { %2566 = shalt.err (!%p2563_p6)
}
 0xa36   :  { %2063 = dma.vmem_to_hbm [thread:$0]  %s2061_s21, 32, %s3377_s7, [#allocation5]  }
 0xa37   :  { %2571 = dma.done.wait [#allocation5], 32  }
 0xa38   :  { %2572 = vsyncadd [#allocation5], 4294967264 }
 0xa39   :  { %2067 = vsyncpa [#allocation4], 1 }
 0xa3a   :  { %2068 = vsyncpa [#allocation5], 1 }
 0xa3b   :  { %2069 = vsyncpa [#allocation6], 1 }

</bundles_post_ra>
